<compile_context>
chip_gen: v6e
topology: v6e:2x2x1
jax: 0.10.0
libtpu: 0.0.40
codegen_flags: <defaults>
</compile_context>

<pallas_src>
import functools
import math

import numpy as np
import jax
import jax.numpy as jnp
from jax import lax
from jax.experimental import pallas as pl
from jax.experimental.pallas import tpu as pltpu


# -----------------------------------------------------------------------------
# Pallas kernels
# -----------------------------------------------------------------------------
def _conv_gemm_relu_kernel(p_ref, w_ref, b_ref, o_ref):
    # p: (1, P, K) bf16 ; w: (K, C) bf16 ; b: (1, C) f32 ; o: (1, P, C) bf16
    acc = jnp.dot(p_ref[0], w_ref[...], preferred_element_type=jnp.float32)
    acc = jnp.maximum(acc + b_ref[...], 0.0)
    o_ref[0] = acc.astype(o_ref.dtype)


def _capsule_head_kernel(p2_ref, w2_ref, b2_ref, wd_ref, wp_ref, bp_ref, adj_ref,
                         o_ref, *, n_caps_types, n_classes):
    """One batch element: primary-caps conv -> squash -> digitCaps -> routing -> log-probs.

    p2 : (1, Nn, K2)  bf16   conv2 im2col patches (Nn = map*map nodes)
    w2 : (T, K2, 8)   bf16   conv2 weight, pre-split per capsule type
    b2 : (T, 1, 8)    f32
    wd : (8, 16)      f32    digitCaps weight (shared, no bias)
    wp : (16, C)      f32    pooling weight        bp : (1, C) f32 bias
    adj: (Nn, Nn)     f32    normalized adjacency
    o  : (1, C, 1)    f32    log(|v|) per class
    """
    eps = 1e-12
    patches = p2_ref[0]
    wd = wd_ref[...]
    wp = wp_ref[...]
    bp = bp_ref[...]
    adj = adj_ref[...]

    pooled = None
    for t in range(n_caps_types):            # T is tiny (out_c//8); unrolled
        # primary caps conv for this capsule type: (Nn, K2) @ (K2, 8)
        c = jnp.dot(patches, w2_ref[t], preferred_element_type=jnp.float32)
        c = c + b2_ref[t]                                            # (Nn, 8)
        # squash over the capsule dim:  x * |x|^2/(1+|x|^2)/|x|
        l2 = jnp.sum(c * c, axis=-1, keepdims=True)                  # (Nn, 1)
        scale = l2 * lax.rsqrt(l2 + eps) * pl.reciprocal(1.0 + l2, approx=True)
        prim = c * scale                                             # (Nn, 8)
        # digitCaps projection (shared weight, no bias)
        u = jnp.dot(prim, wd, preferred_element_type=jnp.float32)    # (Nn, 16)
        # graph-pooling routing: s = adj @ (u @ wp) + b ; softmax over nodes
        s = jnp.dot(u, wp, preferred_element_type=jnp.float32)       # (Nn, C)
        s = jnp.dot(adj, s, preferred_element_type=jnp.float32) + bp
        s = s - jnp.max(s, axis=0, keepdims=True)
        e = jnp.exp(s)
        attn = e * pl.reciprocal(jnp.sum(e, axis=0, keepdims=True), approx=True)
        # attn^T @ u  -> (C, 16)
        pt = lax.dot_general(attn, u, (((0,), (0,)), ((), ())),
                             preferred_element_type=jnp.float32)
        pooled = pt if pooled is None else pooled + pt

    # v = sum_T(pooled)/n_classes ; v_sq = squash(v) ; out = log(|v_sq|)
    # |squash(v)| == |v|^2 / (1 + |v|^2), so log-prob = log(l2) - log(1 + l2).
    v = pooled * (1.0 / n_classes)
    l2v = jnp.sum(v * v, axis=-1, keepdims=True)                     # (C, 1)
    o_ref[0] = jnp.log(l2v + eps) - jnp.log(1.0 + l2v)


# -----------------------------------------------------------------------------
# Pallas wrappers
# -----------------------------------------------------------------------------
def conv_gemm_relu(patches, w_mat, bias, pix_tile=512):
    """relu(patches @ w + b) per batch element; optional pixel tiling for big maps."""
    B, P, K = patches.shape
    N = w_mat.shape[1]
    if P > pix_tile and P % pix_tile == 0 and pix_tile % 8 == 0:
        tp, gp = pix_tile, P // pix_tile        # keeps per-step VMEM bounded (v7x: 64 MiB)
    else:
        tp, gp = P, 1
    grid = (B, gp)
    return pl.pallas_call(
        _conv_gemm_relu_kernel,
        out_shape=jax.ShapeDtypeStruct((B, P, N), jnp.bfloat16),
        grid=grid,
        in_specs=[
            pl.BlockSpec((1, tp, K), lambda b, p: (b, p, 0)),
            pl.BlockSpec((K, N), lambda b, p: (0, 0)),
            pl.BlockSpec((1, N), lambda b, p: (0, 0)),
        ],
        out_specs=pl.BlockSpec((1, tp, N), lambda b, p: (b, p, 0)),
        compiler_params=pltpu.CompilerParams(
            dimension_semantics=("parallel",) * len(grid)),
    )(patches, w_mat, bias)


def capsule_head(p2, w2_caps, b2_caps, digit_w, pool_w, pool_b, adj,
                 *, n_caps_types, n_classes):
    B, Nn, K2 = p2.shape
    T = n_caps_types
    cd, D = digit_w.shape                       # 8, 16
    C = n_classes
    flops = 2 * B * T * (Nn * K2 * cd + Nn * cd * D + Nn * D * C
                         + Nn * Nn * C + C * Nn * D)
    transcendentals = B * T * Nn * (C + 3) + 2 * B * C
    bytes_accessed = (p2.size * 2 + w2_caps.size * 2 + b2_caps.size * 4
                      + digit_w.size * 4 + pool_w.size * 4 + pool_b.size * 4
                      + adj.size * 4 + B * C * 4)
    return pl.pallas_call(
        functools.partial(_capsule_head_kernel,
                          n_caps_types=T, n_classes=C),
        out_shape=jax.ShapeDtypeStruct((B, C, 1), jnp.float32),
        grid=(B,),
        in_specs=[
            pl.BlockSpec((1, Nn, K2), lambda b: (b, 0, 0)),
            pl.BlockSpec((T, K2, cd), lambda b: (0, 0, 0)),
            pl.BlockSpec((T, 1, cd), lambda b: (0, 0, 0)),
            pl.BlockSpec((cd, D), lambda b: (0, 0)),
            pl.BlockSpec((D, C), lambda b: (0, 0)),
            pl.BlockSpec((1, C), lambda b: (0, 0)),
            pl.BlockSpec((Nn, Nn), lambda b: (0, 0)),
        ],
        out_specs=pl.BlockSpec((1, C, 1), lambda b: (b, 0, 0)),
        compiler_params=pltpu.CompilerParams(dimension_semantics=("parallel",)),
        cost_estimate=pl.CostEstimate(flops=int(flops),
                                      transcendentals=int(transcendentals),
                                      bytes_accessed=int(bytes_accessed)),
    )(p2, w2_caps, b2_caps, digit_w, pool_w, pool_b, adj)


# -----------------------------------------------------------------------------
# JAX glue (im2col patch extraction, adjacency buffer, parameter setup)
# -----------------------------------------------------------------------------
def im2col_nchw(x, kh, kw, stride):
    """NCHW input -> (N, Ho*Wo, C*kh*kw) patches; columns ordered (c, tap)."""
    N, Cc, H, W = x.shape
    Ho = (H - kh) // stride + 1
    Wo = (W - kw) // stride + 1
    cols = []
    for i in range(kh):
        for j in range(kw):
            cols.append(x[:, :, i:i + stride * (Ho - 1) + 1:stride,
                          j:j + stride * (Wo - 1) + 1:stride])
    p = jnp.stack(cols, axis=2)              # (N, C, kh*kw, Ho, Wo)
    p = p.transpose(0, 3, 4, 1, 2)           # (N, Ho, Wo, C, kh*kw)
    return p.reshape(N, Ho * Wo, Cc * kh * kw), Ho, Wo


def im2col_nhwc(x, kh, kw, stride):
    """NHWC input -> (N, Ho*Wo, C*kh*kw) patches; columns ordered (c, tap)."""
    N, H, W, Cc = x.shape
    Ho = (H - kh) // stride + 1
    Wo = (W - kw) // stride + 1
    cols = []
    for i in range(kh):
        for j in range(kw):
            cols.append(x[:, i:i + stride * (Ho - 1) + 1:stride,
                          j:j + stride * (Wo - 1) + 1:stride, :])
    p = jnp.stack(cols, axis=4)              # (N, Ho, Wo, C, kh*kw)
    return p.reshape(N, Ho * Wo, Cc * kh * kw), Ho, Wo


def compute_adjacency_matrix_images(coord, sigma=0.1):
    coord = coord.reshape(-1, 2)
    dist = np.sqrt(((coord[:, None, :] - coord[None, :, :]) ** 2).sum(-1))
    A = np.exp(-dist / (sigma * np.pi)) ** 2
    A[np.diag_indices_from(A)] = 0.0
    return A


def build_normalized_adj(map_size, add_loop=True, improved=False):
    coord = np.zeros((map_size, map_size, 2))
    for i in range(map_size):
        for j in range(map_size):
            coord[i, j, 0] = i + 1
            coord[i, j, 1] = j + 1
    adj = compute_adjacency_matrix_images(coord).astype(np.float32)
    Nn = adj.shape[0]
    if add_loop:
        adj = adj.copy()
        adj[np.arange(Nn), np.arange(Nn)] = 1.0 if not improved else 2.0
    deg = np.clip(adj.sum(axis=-1), 1.0, None)
    dis = deg ** -0.5
    adj = dis[:, None] * adj * dis[None, :]
    return jnp.asarray(adj, dtype=jnp.float32)


def init_params(key, in_c, out_c, n_classes, num_primary_caps):
    ks = jax.random.split(key, 6)

    def u(k, shape, bound):
        return jax.random.uniform(k, shape, jnp.float32, -bound, bound)

    b1 = 1.0 / math.sqrt(in_c * 9)
    b2 = 1.0 / math.sqrt(out_c * 9)
    return {
        "conv1_w": u(ks[0], (out_c, in_c, 3, 3), b1),
        "conv1_b": u(ks[1], (out_c,), b1),
        "conv2_w": u(ks[2], ((out_c // 8) * 8, out_c, 3, 3), b2),
        "conv2_b": u(ks[3], ((out_c // 8) * 8,), b2),
        "digit_w": u(ks[4], (8, 16), 1.0 / math.sqrt(num_primary_caps)),
        "pool_w": u(ks[5], (16, n_classes), 1.0 / math.sqrt(16)),
        "pool_b": jnp.zeros((n_classes,), jnp.float32),
    }


# -----------------------------------------------------------------------------
# Full forward pass
# -----------------------------------------------------------------------------
def capsnet_forward(x, params, *, map_size, n_classes, num_caps_types):
    B = x.shape[0]
    caps_dim = 8
    T = num_caps_types

    # --- conv1 (3x3, s=1) + ReLU: im2col + Pallas GEMM; output stays channel-minor
    w1 = params["conv1_w"]
    c1 = w1.shape[0]
    p1, Ho1, Wo1 = im2col_nchw(x, 3, 3, 1)
    h1 = conv_gemm_relu(p1.astype(jnp.bfloat16),
                        w1.reshape(c1, -1).T.astype(jnp.bfloat16),
                        params["conv1_b"].reshape(1, -1))       # (B, Ho1*Wo1, c1) bf16

    # --- primary-caps conv patches (3x3, s=2); no NCHW round-trips
    h1 = h1.reshape(B, Ho1, Wo1, c1)
    p2, Ho2, Wo2 = im2col_nhwc(h1, 3, 3, 2)                     # (B, map*map, c1*9) bf16
    assert Ho2 == map_size and Wo2 == map_size

    # conv2 weight / bias pre-split per capsule type: (T, K2, 8) / (T, 1, 8)
    w2 = params["conv2_w"]
    c2 = w2.shape[0]
    w2_mat = w2.reshape(c2, -1).T                               # (c1*9, c2)
    w2_caps = jnp.transpose(w2_mat.reshape(-1, T, caps_dim),
                            (1, 0, 2)).astype(jnp.bfloat16)
    b2_caps = params["conv2_b"].reshape(T, 1, caps_dim)

    # --- fused: conv2 GEMM -> squash -> digitCaps -> routing -> log-probs
    logp = capsule_head(p2, w2_caps, b2_caps,
                        params["digit_w"], params["pool_w"],
                        params["pool_b"].reshape(1, -1), params["adj"],
                        n_caps_types=T, n_classes=n_classes)
    return logp.reshape(B, n_classes)


# TODO(synk): ReconstructionNet / reconstruct() and the self.caps side-output are
# not part of forward() (reconstructed=False default) and are not implemented.

if __name__ == "__main__":
    # Shapes consistent with the module: in_c=1, out_c=16 -> 2 capsule types;
    # 16x16 input -> conv1 -> 14x14 -> primary conv (k=3,s=2) -> 6x6 => map_size=6.
    B, in_c, H, W = 2, 1, 16, 16
    out_c = 16
    map_size = 6
    n_classes = 10
    num_caps_types = out_c // 8
    num_primary_caps = num_caps_types * map_size * map_size

    key = jax.random.PRNGKey(0)
    kx, kp = jax.random.split(key)
    x = jax.random.normal(kx, (B, in_c, H, W), dtype=jnp.float32)

    params = init_params(kp, in_c, out_c, n_classes, num_primary_caps)
    params["adj"] = build_normalized_adj(map_size)

    fwd = jax.jit(functools.partial(capsnet_forward, map_size=map_size,
                                    n_classes=n_classes,
                                    num_caps_types=num_caps_types))
    out = fwd(x, params)
    jax.block_until_ready(out)
    assert out.shape == (B, n_classes), out.shape
    assert bool(jnp.all(jnp.isfinite(out)))
    print("KERNEL_OK")
</pallas_src>

<mosaic_0001>
module attributes {stable_mosaic.version = 11 : i64} {
  func.func @_conv_gemm_relu_kernel(%arg0: i32, %arg1: i32, %arg2: memref<1x196x9xbf16, #tpu.memory_space<vmem>>, %arg3: memref<9x16xbf16, #tpu.memory_space<vmem>>, %arg4: memref<1x16xf32, #tpu.memory_space<vmem>>, %arg5: memref<1x196x16xbf16, #tpu.memory_space<vmem>>) attributes {dimension_semantics = [#tpu.dimension_semantics<parallel>, #tpu.dimension_semantics<parallel>], iteration_bounds = array<i64: 2, 1>, scalar_prefetch = 0 : i64, scratch_operands = 0 : i64, tpu.core_type = #tpu.core_type<tc>, window_params = [{transform_indices = @transform_0, window_bounds = array<i64: 1, 196, 9>}, {pipeline_mode = #tpu.pipeline_mode<synchronous>, transform_indices = @transform_1, window_bounds = array<i64: 9, 16>}, {pipeline_mode = #tpu.pipeline_mode<synchronous>, transform_indices = @transform_2, window_bounds = array<i64: 1, 16>}, {transform_indices = @transform_3, window_bounds = array<i64: 1, 196, 16>}]} {
    %c0 = arith.constant 0 : index
    %c0_0 = arith.constant 0 : index
    %c0_1 = arith.constant 0 : index
    %0 = vector.load %arg2[%c0, %c0_0, %c0_1] : memref<1x196x9xbf16, #tpu.memory_space<vmem>>, vector<1x196x9xbf16>
    %1 = vector.shape_cast %0 : vector<1x196x9xbf16> to vector<196x9xbf16>
    %c0_2 = arith.constant 0 : index
    %c0_3 = arith.constant 0 : index
    %2 = vector.load %arg3[%c0_2, %c0_3] : memref<9x16xbf16, #tpu.memory_space<vmem>>, vector<9x16xbf16>
    %cst = arith.constant dense<0.000000e+00> : vector<196x16xf32>
    %3 = tpu.matmul %1, %2, %cst {dimension_numbers = #tpu.dot_dimension_numbers<[1], [0], [0], [1], [0, 0, 1, 1], [], []>} : vector<196x9xbf16>, vector<9x16xbf16>, vector<196x16xf32> -> vector<196x16xf32>
    %c0_4 = arith.constant 0 : index
    %c0_5 = arith.constant 0 : index
    %4 = vector.load %arg4[%c0_4, %c0_5] : memref<1x16xf32, #tpu.memory_space<vmem>>, vector<1x16xf32>
    %5 = vector.broadcast %4 : vector<1x16xf32> to vector<196x16xf32>
    %6 = arith.addf %3, %5 : vector<196x16xf32>
    %cst_6 = arith.constant 0.000000e+00 : f32
    %7 = vector.broadcast %cst_6 : f32 to vector<196x16xf32>
    %8 = arith.maximumf %6, %7 : vector<196x16xf32>
    %9 = arith.truncf %8 : vector<196x16xf32> to vector<196x16xbf16>
    %c0_7 = arith.constant 0 : index
    %c0_8 = arith.constant 0 : index
    %c0_9 = arith.constant 0 : index
    %10 = vector.load %arg5[%c0_7, %c0_8, %c0_9] : memref<1x196x16xbf16, #tpu.memory_space<vmem>>, vector<1x196x16xbf16>
    %11 = vector.shape_cast %10 : vector<1x196x16xbf16> to vector<196x16xbf16>
    %12 = vector.shape_cast %9 : vector<196x16xbf16> to vector<1x196x16xbf16>
    tpu.vector_store %arg5[%c0_7, %c0_8, %c0_9], %12 {strides = array<i32>} : memref<1x196x16xbf16, #tpu.memory_space<vmem>>, vector<1x196x16xbf16>,
    return
  }
  func.func @transform_0(%arg0: i32, %arg1: i32) -> (i32, i32, i32) {
    %c0_i32 = arith.constant 0 : i32
    %c0_i32_0 = arith.constant 0 : i32
    return %arg0, %arg1, %c0_i32 : i32, i32, i32
  }
  func.func @transform_1(%arg0: i32, %arg1: i32) -> (i32, i32) {
    %c0_i32 = arith.constant 0 : i32
    %c0_i32_0 = arith.constant 0 : i32
    %c0_i32_1 = arith.constant 0 : i32
    return %c0_i32, %c0_i32_0 : i32, i32
  }
  func.func @transform_2(%arg0: i32, %arg1: i32) -> (i32, i32) {
    %c0_i32 = arith.constant 0 : i32
    %c0_i32_0 = arith.constant 0 : i32
    %c0_i32_1 = arith.constant 0 : i32
    return %c0_i32, %c0_i32_0 : i32, i32
  }
  func.func @transform_3(%arg0: i32, %arg1: i32) -> (i32, i32, i32) {
    %c0_i32 = arith.constant 0 : i32
    %c0_i32_0 = arith.constant 0 : i32
    return %arg0, %arg1, %c0_i32 : i32, i32, i32
  }
}

module attributes {stable_mosaic.version = 11 : i64} {
  func.func @_capsule_head_kernel(%arg0: i32, %arg1: memref<1x36x144xbf16, #tpu.memory_space<vmem>>, %arg2: memref<2x144x8xbf16, #tpu.memory_space<vmem>>, %arg3: memref<2x1x8xf32, #tpu.memory_space<vmem>>, %arg4: memref<8x16xf32, #tpu.memory_space<vmem>>, %arg5: memref<16x10xf32, #tpu.memory_space<vmem>>, %arg6: memref<1x10xf32, #tpu.memory_space<vmem>>, %arg7: memref<36x36xf32, #tpu.memory_space<vmem>>, %arg8: memref<1x10x1xf32, #tpu.memory_space<vmem>>) attributes {dimension_semantics = [#tpu.dimension_semantics<parallel>], iteration_bounds = array<i64: 2>, scalar_prefetch = 0 : i64, scratch_operands = 0 : i64, tpu.core_type = #tpu.core_type<tc>, window_params = [{transform_indices = @transform_0, window_bounds = array<i64: 1, 36, 144>}, {pipeline_mode = #tpu.pipeline_mode<synchronous>, transform_indices = @transform_1, window_bounds = array<i64: 2, 144, 8>}, {pipeline_mode = #tpu.pipeline_mode<synchronous>, transform_indices = @transform_2, window_bounds = array<i64: 2, 1, 8>}, {pipeline_mode = #tpu.pipeline_mode<synchronous>, transform_indices = @transform_3, window_bounds = array<i64: 8, 16>}, {pipeline_mode = #tpu.pipeline_mode<synchronous>, transform_indices = @transform_4, window_bounds = array<i64: 16, 10>}, {pipeline_mode = #tpu.pipeline_mode<synchronous>, transform_indices = @transform_5, window_bounds = array<i64: 1, 10>}, {pipeline_mode = #tpu.pipeline_mode<synchronous>, transform_indices = @transform_6, window_bounds = array<i64: 36, 36>}, {transform_indices = @transform_7, window_bounds = array<i64: 1, 10, 1>}]} {
    %c0 = arith.constant 0 : index
    %c0_0 = arith.constant 0 : index
    %c0_1 = arith.constant 0 : index
    %0 = vector.load %arg1[%c0, %c0_0, %c0_1] : memref<1x36x144xbf16, #tpu.memory_space<vmem>>, vector<1x36x144xbf16>
    %1 = vector.shape_cast %0 : vector<1x36x144xbf16> to vector<36x144xbf16>
    %c0_2 = arith.constant 0 : index
    %c0_3 = arith.constant 0 : index
    %2 = vector.load %arg4[%c0_2, %c0_3] : memref<8x16xf32, #tpu.memory_space<vmem>>, vector<8x16xf32>
    %c0_4 = arith.constant 0 : index
    %c0_5 = arith.constant 0 : index
    %3 = vector.load %arg5[%c0_4, %c0_5] : memref<16x10xf32, #tpu.memory_space<vmem>>, vector<16x10xf32>
    %c0_6 = arith.constant 0 : index
    %c0_7 = arith.constant 0 : index
    %4 = vector.load %arg6[%c0_6, %c0_7] : memref<1x10xf32, #tpu.memory_space<vmem>>, vector<1x10xf32>
    %c0_8 = arith.constant 0 : index
    %c0_9 = arith.constant 0 : index
    %5 = vector.load %arg7[%c0_8, %c0_9] : memref<36x36xf32, #tpu.memory_space<vmem>>, vector<36x36xf32>
    %c0_10 = arith.constant 0 : index
    %c0_11 = arith.constant 0 : index
    %c0_12 = arith.constant 0 : index
    %6 = vector.load %arg2[%c0_10, %c0_11, %c0_12] : memref<2x144x8xbf16, #tpu.memory_space<vmem>>, vector<1x144x8xbf16>
    %7 = vector.shape_cast %6 : vector<1x144x8xbf16> to vector<144x8xbf16>
    %cst = arith.constant dense<0.000000e+00> : vector<36x8xf32>
    %8 = tpu.matmul %1, %7, %cst {dimension_numbers = #tpu.dot_dimension_numbers<[1], [0], [0], [1], [0, 0, 1, 1], [], []>} : vector<36x144xbf16>, vector<144x8xbf16>, vector<36x8xf32> -> vector<36x8xf32>
    %c0_13 = arith.constant 0 : index
    %c0_14 = arith.constant 0 : index
    %c0_15 = arith.constant 0 : index
    %9 = vector.load %arg3[%c0_13, %c0_14, %c0_15] : memref<2x1x8xf32, #tpu.memory_space<vmem>>, vector<1x1x8xf32>
    %10 = vector.shape_cast %9 : vector<1x1x8xf32> to vector<1x8xf32>
    %11 = vector.broadcast %10 : vector<1x8xf32> to vector<36x8xf32>
    %12 = arith.addf %8, %11 : vector<36x8xf32>
    %13 = arith.mulf %12, %12 : vector<36x8xf32>
    %cst_16 = arith.constant dense<0.000000e+00> : vector<36xf32>
    %14 = vector.multi_reduction <add>, %13, %cst_16 [1] : vector<36x8xf32> to vector<36xf32>
    %15 = vector.shape_cast %14 : vector<36xf32> to vector<36x1xf32>
    %cst_17 = arith.constant 9.99999996E-13 : f32
    %16 = vector.broadcast %cst_17 : f32 to vector<36x1xf32>
    %17 = arith.addf %15, %16 : vector<36x1xf32>
    %18 = math.rsqrt %17 : vector<36x1xf32>
    %19 = arith.mulf %15, %18 : vector<36x1xf32>
    %cst_18 = arith.constant 1.000000e+00 : f32
    %20 = vector.broadcast %cst_18 : f32 to vector<36x1xf32>
    %21 = arith.addf %20, %15 : vector<36x1xf32>
    %22 = tpu.reciprocal %21 {approx = true} : vector<36x1xf32> -> vector<36x1xf32>
    %23 = arith.mulf %19, %22 : vector<36x1xf32>
    %24 = vector.broadcast %23 : vector<36x1xf32> to vector<36x8xf32>
    %25 = arith.mulf %12, %24 : vector<36x8xf32>
    %cst_19 = arith.constant dense<0.000000e+00> : vector<36x16xf32>
    %26 = tpu.matmul %25, %2, %cst_19 {dimension_numbers = #tpu.dot_dimension_numbers<[1], [0], [0], [1], [0, 0, 1, 1], [], []>} : vector<36x8xf32>, vector<8x16xf32>, vector<36x16xf32> -> vector<36x16xf32>
    %cst_20 = arith.constant dense<0.000000e+00> : vector<36x10xf32>
    %27 = tpu.matmul %26, %3, %cst_20 {dimension_numbers = #tpu.dot_dimension_numbers<[1], [0], [0], [1], [0, 0, 1, 1], [], []>} : vector<36x16xf32>, vector<16x10xf32>, vector<36x10xf32> -> vector<36x10xf32>
    %cst_21 = arith.constant dense<0.000000e+00> : vector<36x10xf32>
    %28 = tpu.matmul %5, %27, %cst_21 {dimension_numbers = #tpu.dot_dimension_numbers<[1], [0], [0], [1], [0, 0, 1, 1], [], []>} : vector<36x36xf32>, vector<36x10xf32>, vector<36x10xf32> -> vector<36x10xf32>
    %29 = vector.broadcast %4 : vector<1x10xf32> to vector<36x10xf32>
    %30 = arith.addf %28, %29 : vector<36x10xf32>
    %cst_22 = arith.constant dense<0xFF800000> : vector<10xf32>
    %31 = vector.multi_reduction <maximumf>, %30, %cst_22 [0] : vector<36x10xf32> to vector<10xf32>
    %32 = vector.shape_cast %31 : vector<10xf32> to vector<1x10xf32>
    %33 = vector.broadcast %32 : vector<1x10xf32> to vector<36x10xf32>
    %34 = arith.subf %30, %33 : vector<36x10xf32>
    %35 = math.exp %34 : vector<36x10xf32>
    %cst_23 = arith.constant dense<0.000000e+00> : vector<10xf32>
    %36 = vector.multi_reduction <add>, %35, %cst_23 [0] : vector<36x10xf32> to vector<10xf32>
    %37 = vector.shape_cast %36 : vector<10xf32> to vector<1x10xf32>
    %38 = tpu.reciprocal %37 {approx = true} : vector<1x10xf32> -> vector<1x10xf32>
    %39 = vector.broadcast %38 : vector<1x10xf32> to vector<36x10xf32>
    %40 = arith.mulf %35, %39 : vector<36x10xf32>
    %cst_24 = arith.constant dense<0.000000e+00> : vector<10x16xf32>
    %41 = tpu.matmul %40, %26, %cst_24 {dimension_numbers = #tpu.dot_dimension_numbers<[0], [0], [1], [1], [0, 1, 1, 1], [], []>} : vector<36x10xf32>, vector<36x16xf32>, vector<10x16xf32> -> vector<10x16xf32>
    %c1 = arith.constant 1 : index
    %c0_25 = arith.constant 0 : index
    %c0_26 = arith.constant 0 : index
    %42 = vector.load %arg2[%c1, %c0_25, %c0_26] : memref<2x144x8xbf16, #tpu.memory_space<vmem>>, vector<1x144x8xbf16>
    %43 = vector.shape_cast %42 : vector<1x144x8xbf16> to vector<144x8xbf16>
    %cst_27 = arith.constant dense<0.000000e+00> : vector<36x8xf32>
    %44 = tpu.matmul %1, %43, %cst_27 {dimension_numbers = #tpu.dot_dimension_numbers<[1], [0], [0], [1], [0, 0, 1, 1], [], []>} : vector<36x144xbf16>, vector<144x8xbf16>, vector<36x8xf32> -> vector<36x8xf32>
    %c1_28 = arith.constant 1 : index
    %c0_29 = arith.constant 0 : index
    %c0_30 = arith.constant 0 : index
    %45 = vector.load %arg3[%c1_28, %c0_29, %c0_30] : memref<2x1x8xf32, #tpu.memory_space<vmem>>, vector<1x1x8xf32>
    %46 = vector.shape_cast %45 : vector<1x1x8xf32> to vector<1x8xf32>
    %47 = vector.broadcast %46 : vector<1x8xf32> to vector<36x8xf32>
    %48 = arith.addf %44, %47 : vector<36x8xf32>
    %49 = arith.mulf %48, %48 : vector<36x8xf32>
    %cst_31 = arith.constant dense<0.000000e+00> : vector<36xf32>
    %50 = vector.multi_reduction <add>, %49, %cst_31 [1] : vector<36x8xf32> to vector<36xf32>
    %51 = vector.shape_cast %50 : vector<36xf32> to vector<36x1xf32>
    %cst_32 = arith.constant 9.99999996E-13 : f32
    %52 = vector.broadcast %cst_32 : f32 to vector<36x1xf32>
    %53 = arith.addf %51, %52 : vector<36x1xf32>
    %54 = math.rsqrt %53 : vector<36x1xf32>
    %55 = arith.mulf %51, %54 : vector<36x1xf32>
    %cst_33 = arith.constant 1.000000e+00 : f32
    %56 = vector.broadcast %cst_33 : f32 to vector<36x1xf32>
    %57 = arith.addf %56, %51 : vector<36x1xf32>
    %58 = tpu.reciprocal %57 {approx = true} : vector<36x1xf32> -> vector<36x1xf32>
    %59 = arith.mulf %55, %58 : vector<36x1xf32>
    %60 = vector.broadcast %59 : vector<36x1xf32> to vector<36x8xf32>
    %61 = arith.mulf %48, %60 : vector<36x8xf32>
    %cst_34 = arith.constant dense<0.000000e+00> : vector<36x16xf32>
    %62 = tpu.matmul %61, %2, %cst_34 {dimension_numbers = #tpu.dot_dimension_numbers<[1], [0], [0], [1], [0, 0, 1, 1], [], []>} : vector<36x8xf32>, vector<8x16xf32>, vector<36x16xf32> -> vector<36x16xf32>
    %cst_35 = arith.constant dense<0.000000e+00> : vector<36x10xf32>
    %63 = tpu.matmul %62, %3, %cst_35 {dimension_numbers = #tpu.dot_dimension_numbers<[1], [0], [0], [1], [0, 0, 1, 1], [], []>} : vector<36x16xf32>, vector<16x10xf32>, vector<36x10xf32> -> vector<36x10xf32>
    %cst_36 = arith.constant dense<0.000000e+00> : vector<36x10xf32>
    %64 = tpu.matmul %5, %63, %cst_36 {dimension_numbers = #tpu.dot_dimension_numbers<[1], [0], [0], [1], [0, 0, 1, 1], [], []>} : vector<36x36xf32>, vector<36x10xf32>, vector<36x10xf32> -> vector<36x10xf32>
    %65 = vector.broadcast %4 : vector<1x10xf32> to vector<36x10xf32>
    %66 = arith.addf %64, %65 : vector<36x10xf32>
    %cst_37 = arith.constant dense<0xFF800000> : vector<10xf32>
    %67 = vector.multi_reduction <maximumf>, %66, %cst_37 [0] : vector<36x10xf32> to vector<10xf32>
    %68 = vector.shape_cast %67 : vector<10xf32> to vector<1x10xf32>
    %69 = vector.broadcast %68 : vector<1x10xf32> to vector<36x10xf32>
    %70 = arith.subf %66, %69 : vector<36x10xf32>
    %71 = math.exp %70 : vector<36x10xf32>
    %cst_38 = arith.constant dense<0.000000e+00> : vector<10xf32>
    %72 = vector.multi_reduction <add>, %71, %cst_38 [0] : vector<36x10xf32> to vector<10xf32>
    %73 = vector.shape_cast %72 : vector<10xf32> to vector<1x10xf32>
    %74 = tpu.reciprocal %73 {approx = true} : vector<1x10xf32> -> vector<1x10xf32>
    %75 = vector.broadcast %74 : vector<1x10xf32> to vector<36x10xf32>
    %76 = arith.mulf %71, %75 : vector<36x10xf32>
    %cst_39 = arith.constant dense<0.000000e+00> : vector<10x16xf32>
    %77 = tpu.matmul %76, %62, %cst_39 {dimension_numbers = #tpu.dot_dimension_numbers<[0], [0], [1], [1], [0, 1, 1, 1], [], []>} : vector<36x10xf32>, vector<36x16xf32>, vector<10x16xf32> -> vector<10x16xf32>
    %78 = arith.addf %41, %77 : vector<10x16xf32>
    %cst_40 = arith.constant 1.000000e-01 : f32
    %79 = vector.broadcast %cst_40 : f32 to vector<10x16xf32>
    %80 = arith.mulf %78, %79 : vector<10x16xf32>
    %81 = arith.mulf %80, %80 : vector<10x16xf32>
    %cst_41 = arith.constant dense<0.000000e+00> : vector<10xf32>
    %82 = vector.multi_reduction <add>, %81, %cst_41 [1] : vector<10x16xf32> to vector<10xf32>
    %83 = vector.shape_cast %82 : vector<10xf32> to vector<10x1xf32>
    %cst_42 = arith.constant 9.99999996E-13 : f32
    %84 = vector.broadcast %cst_42 : f32 to vector<10x1xf32>
    %85 = arith.addf %83, %84 : vector<10x1xf32>
    %86 = math.log %85 : vector<10x1xf32>
    %cst_43 = arith.constant 1.000000e+00 : f32
    %87 = vector.broadcast %cst_43 : f32 to vector<10x1xf32>
    %88 = arith.addf %87, %83 : vector<10x1xf32>
    %89 = math.log %88 : vector<10x1xf32>
    %90 = arith.subf %86, %89 : vector<10x1xf32>
    %c0_44 = arith.constant 0 : index
    %c0_45 = arith.constant 0 : index
    %c0_46 = arith.constant 0 : index
    %91 = vector.load %arg8[%c0_44, %c0_45, %c0_46] : memref<1x10x1xf32, #tpu.memory_space<vmem>>, vector<1x10x1xf32>
    %92 = vector.shape_cast %91 : vector<1x10x1xf32> to vector<10x1xf32>
    %93 = vector.shape_cast %90 : vector<10x1xf32> to vector<1x10x1xf32>
    tpu.vector_store %arg8[%c0_44, %c0_45, %c0_46], %93 {strides = array<i32>} : memref<1x10x1xf32, #tpu.memory_space<vmem>>, vector<1x10x1xf32>,
    return
  }
  func.func @transform_0(%arg0: i32) -> (i32, i32, i32) {
    %c0_i32 = arith.constant 0 : i32
    %c0_i32_0 = arith.constant 0 : i32
    %c0_i32_1 = arith.constant 0 : i32
    return %arg0, %c0_i32, %c0_i32_0 : i32, i32, i32
  }
  func.func @transform_1(%arg0: i32) -> (i32, i32, i32) {
    %c0_i32 = arith.constant 0 : i32
    %c0_i32_0 = arith.constant 0 : i32
    %c0_i32_1 = arith.constant 0 : i32
    %c0_i32_2 = arith.constant 0 : i32
    return %c0_i32, %c0_i32_0, %c0_i32_1 : i32, i32, i32
  }
  func.func @transform_2(%arg0: i32) -> (i32, i32, i32) {
    %c0_i32 = arith.constant 0 : i32
    %c0_i32_0 = arith.constant 0 : i32
    %c0_i32_1 = arith.constant 0 : i32
    %c0_i32_2 = arith.constant 0 : i32
    return %c0_i32, %c0_i32_0, %c0_i32_1 : i32, i32, i32
  }
  func.func @transform_3(%arg0: i32) -> (i32, i32) {
    %c0_i32 = arith.constant 0 : i32
    %c0_i32_0 = arith.constant 0 : i32
    %c0_i32_1 = arith.constant 0 : i32
    return %c0_i32, %c0_i32_0 : i32, i32
  }
  func.func @transform_4(%arg0: i32) -> (i32, i32) {
    %c0_i32 = arith.constant 0 : i32
    %c0_i32_0 = arith.constant 0 : i32
    %c0_i32_1 = arith.constant 0 : i32
    return %c0_i32, %c0_i32_0 : i32, i32
  }
  func.func @transform_5(%arg0: i32) -> (i32, i32) {
    %c0_i32 = arith.constant 0 : i32
    %c0_i32_0 = arith.constant 0 : i32
    %c0_i32_1 = arith.constant 0 : i32
    return %c0_i32, %c0_i32_0 : i32, i32
  }
  func.func @transform_6(%arg0: i32) -> (i32, i32) {
    %c0_i32 = arith.constant 0 : i32
    %c0_i32_0 = arith.constant 0 : i32
    %c0_i32_1 = arith.constant 0 : i32
    return %c0_i32, %c0_i32_0 : i32, i32
  }
  func.func @transform_7(%arg0: i32) -> (i32, i32, i32) {
    %c0_i32 = arith.constant 0 : i32
    %c0_i32_0 = arith.constant 0 : i32
    %c0_i32_1 = arith.constant 0 : i32
    return %arg0, %c0_i32, %c0_i32_0 : i32, i32, i32
  }
}

</mosaic_0001>

<bundles_post_ra>
// kernel: capsnet_forward.2
= control target key start
LH: loop header
LB: loop body
LE: loop exit
PB: predicated region body
PF: predicated region fallthrough
CT: control target
= control target key end

     0   :  { %s982_s12 = smov 0   ;;  %s984_s13 = smov 0   ;;  %s1147_s0 = inlined_call_operand.vmem [shape: bf16[2,196,9], index: 0, kind: input, shape index: {}]   ;;  %s1148_s1 = inlined_call_operand.vmem [shape: bf16[9,16], index: 1, kind: input, shape index: {}]   ;;  %s1149_s2 = inlined_call_operand.vmem [shape: f32[1,16], index: 2, kind: input, shape index: {}]   ;;  %s1150_s3 = inlined_call_operand.vmem [shape: bf16[2,196,16], index: 3, kind: output, shape index: {}]  }
   0x1   :  { %s986_s14 = smov 0  }
   0x2 LB: > { %s25_s15 = sadd.s32 1, %s953_s13  ;;  %p740_p0 = scmp.ge.s32.totalorder %s957_s14, 1  ;;  %s957_s14 = sphi %s986_s14, %s13_s14   ;;  %s953_s13 = sphi %s984_s13, %s1152_s13   ;;  %s949_s12 = sphi %s982_s12, %s1151_s12  }
   0x3   : > { %p27_p1 = scmp.ge.s32.totalorder %s25_s15, 2  ;;  %p158_p2 = scmp.lt.s32.totalorder %s957_s14, 3 }
   0x5   : > { %s1154_s15 = smov (%p27_p1, %s25_s15), 0  ;;  %p159_p3 = pnand %p740_p0, %p158_p2 }
   0x6   : > { %p191_p4 = scmp.lt.s32.totalorder (!%p159_p3), %s949_s12, 1 }
   0x7   : > { %162 = sbr.rel (%p159_p3) target bundleno = 272 (0x110), region = 32 }
   0xc   : > { %vm353_vm0 = vcmask 1043456   ;;  %v959_v0 = vmov 0.0   ;;  %v921_v1 = vld [vmem:[%s1148_s1] sm:$0x1f]   ;;  %vm354_vm1 = vcmask 1044480   ;;  %v960_v2 = vmov 65535  }
   0xd   : > { %837 = vmatprep.subr.bf16.mxu0 %v959_v0  ;;  %891 = vmatprep.subr.bf16.mxu1 %v959_v0  ;;  %v355_v3 = vsel %vm353_vm0, 4294967295, %v960_v2  ;;  %vm961_vm2 = vmmov 0   ;;  %s1156_s12 = smov (!%p191_p4, %s949_s12), 1  ;;  %vm313_vm3 = vcmask 72704   ;;  %v1055_v19 = vld [vmem:[%s1149_s2] ss:$0 sm:$0xff] }
   0xe   : > { %839 = vmatprep.mubr.msk.bf16.mxu0 %vm961_vm2, %v959_v0  ;;  %867 = vmatprep.mubr.msk.bf16.mxu1 %vm961_vm2, %v959_v0  ;;  %v356_v4 = vsel %vm354_vm1, %v355_v3, 0  ;;  %s893_s18 = smul.u32 100, %s1156_s12  ;;  %vm622_vm4 = vcmask 125952   ;;  %vm647_vm5 = vcmask 123904  }
   0xf   : > { %v358_v5 = vand.u32 %v921_v1, %v356_v4 }
  0x10   : > { %s1013_s21 = scalar_lea.vmem %s1147_s0, %s893_s18  ;;  %s1064_s26 = scalar_lea.vmem %s1150_s3, %s893_s18 }
  0x11   : > { %838 = vmatpush3.bf16.msra.mxu0 %v358_v5  ;;  %892 = vmatpush3.bf16.msra.mxu1 %v358_v5  ;;  %v922_v6 = vld [vmem:[%s1013_s21] sm:$0xff]   ;;  %v923_v7 = vld [vmem:[%s1013_s21 + $0x38] sm:$0xff]   ;;  %v924_v8 = vld [vmem:[%s1013_s21 + $0x8] sm:$0xff]  }
  0x12   : > { %v925_v9 = vld [vmem:[%s1013_s21 + $0x40] sm:$0xff]   ;;  %v926_v10 = vld [vmem:[%s1013_s21 + $0x10] sm:$0xff]   ;;  %v927_v11 = vld [vmem:[%s1013_s21 + $0x48] sm:$0xff]  }
  0x13   : > { %v928_v12 = vld [vmem:[%s1013_s21 + $0x18] sm:$0xff]   ;;  %v929_v13 = vld [vmem:[%s1013_s21 + $0x50] sm:$0xff]   ;;  %v930_v14 = vld [vmem:[%s1013_s21 + $0x20] sm:$0xff]  }
  0x14   : > { %840 = vmatmul.mubr.msk.bf16.vlgmr.msra.gmra.mxu0 %vm313_vm3, %v922_v6  ;;  %868 = vmatmul.mubr.msk.bf16.vlgmr.msra.gmra.mxu1 %vm313_vm3, %v923_v7  ;;  %v931_v15 = vld [vmem:[%s1013_s21 + $0x58] sm:$0xff]   ;;  %v932_v16 = vld [vmem:[%s1013_s21 + $0x28] sm:$0xff]   ;;  %v933_v17 = vld [vmem:[%s1013_s21 + $0x60] ss:$0 sps:$4 sm:$0x33]  }
  0x15   : > { %843 = vmatprep.mubr.msk.bf16.mxu0 %vm961_vm2, %v959_v0  ;;  %871 = vmatprep.mubr.msk.bf16.mxu1 %vm961_vm2, %v959_v0  ;;  %v934_v18 = vld [vmem:[%s1013_s21 + $0x30] sm:$0xff]  }
  0x1c   : > { %844 = vmatmul.mubr.msk.bf16.gmra.mxu0 %vm313_vm3, %v924_v8  ;;  %872 = vmatmul.mubr.msk.bf16.gmra.mxu1 %vm313_vm3, %v925_v9 }
  0x1d   : > { %847 = vmatprep.mubr.msk.bf16.mxu0 %vm961_vm2, %v959_v0  ;;  %875 = vmatprep.mubr.msk.bf16.mxu1 %vm961_vm2, %v959_v0 }
  0x24   : > { %848 = vmatmul.mubr.msk.bf16.gmra.mxu0 %vm313_vm3, %v926_v10  ;;  %876 = vmatmul.mubr.msk.bf16.gmra.mxu1 %vm313_vm3, %v927_v11 }
  0x25   : > { %851 = vmatprep.mubr.msk.bf16.mxu0 %vm961_vm2, %v959_v0  ;;  %879 = vmatprep.mubr.msk.bf16.mxu1 %vm961_vm2, %v959_v0 }
  0x2c   : > { %852 = vmatmul.mubr.msk.bf16.gmra.mxu0 %vm313_vm3, %v928_v12  ;;  %880 = vmatmul.mubr.msk.bf16.gmra.mxu1 %vm313_vm3, %v929_v13 }
  0x2d   : > { %855 = vmatprep.mubr.msk.bf16.mxu0 %vm961_vm2, %v959_v0  ;;  %883 = vmatprep.mubr.msk.bf16.mxu1 %vm961_vm2, %v959_v0 }
  0x34   : > { %856 = vmatmul.mubr.msk.bf16.gmra.mxu0 %vm313_vm3, %v930_v14  ;;  %884 = vmatmul.mubr.msk.bf16.gmra.mxu1 %vm313_vm3, %v931_v15 }
  0x35   : > { %859 = vmatprep.mubr.msk.bf16.mxu0 %vm961_vm2, %v959_v0  ;;  %887 = vmatprep.mubr.msk.bf16.mxu1 %vm961_vm2, %v959_v0 }
  0x3c   : > { %860 = vmatmul.mubr.msk.bf16.gmra.mxu0 %vm313_vm3, %v932_v16  ;;  %888 = vmatmul.mubr.msk.bf16.gmra.mxu1 %vm313_vm3, %v933_v17 }
  0x3d   : > { %863 = vmatprep.mubr.msk.bf16.mxu0 %vm961_vm2, %v959_v0 }
  0x44   : > { %864 = vmatmul.mubr.msk.bf16.gmra.mxu0 %vm313_vm3, %v934_v18 }
  0xd4   : > { %v394_v20 = vpop.f32.mrf.mxu0  ;;  %v450_v22 = vpop.f32.mrf.mxu1 }
  0xd5   : > { %v395_v21 = vadd.f32 %v1055_v19, %v394_v20  ;;  %v451_v24 = vadd.f32 %v1055_v19, %v450_v22 }
  0xd6   : > { %v841_v23 = vpop.f32.mrf.mxu0  ;;  %v869_v26 = vpop.f32.mrf.mxu1 }
  0xd7   : > { %v496_v25 = vmax.f32 %v395_v21, 0.0  ;;  %v510_v28 = vmax.f32 %v451_v24, 0.0 }
  0xd8   : > { %v397_v27 = vpop.f32.mrf.mxu0  ;;  %v453_v31 = vpop.f32.mrf.mxu1 }
  0xd9   : > { %v798_v29 = vpack.c.bf16 %v496_v25, %v496_v25  ;;  %v398_v30 = vadd.f32 %v1055_v19, %v397_v27  ;;  %v812_v33 = vpack.c.bf16 %v510_v28, %v510_v28  ;;  %v454_v34 = vadd.f32 %v1055_v19, %v453_v31 }
  0xda   : > { %v842_v32 = vpop.f32.mrf.mxu0  ;;  %v870_v36 = vpop.f32.mrf.mxu1 }
  0xdb   : > { %623 = vst.msk [vmem:[%s1064_s26] sm:$0xf] %vm622_vm4, %v798_v29  ;;  %v497_v35 = vmax.f32 %v398_v30, 0.0  ;;  %637 = vst.msk [vmem:[%s1064_s26 + $0x38] sm:$0xf] %vm622_vm4, %v812_v33  ;;  %v511_v38 = vmax.f32 %v454_v34, 0.0 }
  0xdc   : > { %v402_v37 = vpop.f32.mrf.mxu0  ;;  %v458_v41 = vpop.f32.mrf.mxu1 }
  0xdd   : > { %v799_v39 = vpack.c.bf16 %v497_v35, %v497_v35  ;;  %v403_v40 = vadd.f32 %v1055_v19, %v402_v37  ;;  %v813_v43 = vpack.c.bf16 %v511_v38, %v511_v38  ;;  %v459_v44 = vadd.f32 %v1055_v19, %v458_v41 }
  0xde   : > { %v845_v42 = vpop.f32.mrf.mxu0  ;;  %v873_v46 = vpop.f32.mrf.mxu1 }
  0xdf   : > { %624 = vst.msk [vmem:[%s1064_s26 + $0x4] sm:$0xf] %vm622_vm4, %v799_v39  ;;  %v498_v45 = vmax.f32 %v403_v40, 0.0  ;;  %638 = vst.msk [vmem:[%s1064_s26 + $0x3c] sm:$0xf] %vm622_vm4, %v813_v43  ;;  %v512_v48 = vmax.f32 %v459_v44, 0.0 }
  0xe0   : > { %v405_v47 = vpop.f32.mrf.mxu0  ;;  %v461_v51 = vpop.f32.mrf.mxu1 }
  0xe1   : > { %v800_v49 = vpack.c.bf16 %v498_v45, %v498_v45  ;;  %v406_v50 = vadd.f32 %v1055_v19, %v405_v47  ;;  %v814_v53 = vpack.c.bf16 %v512_v48, %v512_v48  ;;  %v462_v54 = vadd.f32 %v1055_v19, %v461_v51 }
  0xe2   : > { %v846_v52 = vpop.f32.mrf.mxu0  ;;  %v874_v56 = vpop.f32.mrf.mxu1 }
  0xe3   : > { %625 = vst.msk [vmem:[%s1064_s26 + $0x8] sm:$0xf] %vm622_vm4, %v800_v49  ;;  %v499_v55 = vmax.f32 %v406_v50, 0.0  ;;  %639 = vst.msk [vmem:[%s1064_s26 + $0x40] sm:$0xf] %vm622_vm4, %v814_v53  ;;  %v513_v58 = vmax.f32 %v462_v54, 0.0 }
  0xe4   : > { %v410_v57 = vpop.f32.mrf.mxu0  ;;  %v466_v61 = vpop.f32.mrf.mxu1 }
  0xe5   : > { %v801_v59 = vpack.c.bf16 %v499_v55, %v499_v55  ;;  %v411_v60 = vadd.f32 %v1055_v19, %v410_v57  ;;  %v815_v63 = vpack.c.bf16 %v513_v58, %v513_v58  ;;  %v467_v0 = vadd.f32 %v1055_v19, %v466_v61 }
  0xe6   : > { %v849_v62 = vpop.f32.mrf.mxu0  ;;  %v877_v2 = vpop.f32.mrf.mxu1 }
  0xe7   : > { %626 = vst.msk [vmem:[%s1064_s26 + $0xc] sm:$0xf] %vm622_vm4, %v801_v59  ;;  %v500_v1 = vmax.f32 %v411_v60, 0.0  ;;  %640 = vst.msk [vmem:[%s1064_s26 + $0x44] sm:$0xf] %vm622_vm4, %v815_v63  ;;  %v514_v4 = vmax.f32 %v467_v0, 0.0 }
  0xe8   : > { %v413_v3 = vpop.f32.mrf.mxu0  ;;  %v469_v7 = vpop.f32.mrf.mxu1 }
  0xe9   : > { %v802_v5 = vpack.c.bf16 %v500_v1, %v500_v1  ;;  %v414_v6 = vadd.f32 %v1055_v19, %v413_v3  ;;  %v816_v9 = vpack.c.bf16 %v514_v4, %v514_v4  ;;  %v470_v10 = vadd.f32 %v1055_v19, %v469_v7 }
  0xea   : > { %v850_v8 = vpop.f32.mrf.mxu0  ;;  %v878_v12 = vpop.f32.mrf.mxu1 }
  0xeb   : > { %627 = vst.msk [vmem:[%s1064_s26 + $0x10] sm:$0xf] %vm622_vm4, %v802_v5  ;;  %v501_v11 = vmax.f32 %v414_v6, 0.0  ;;  %641 = vst.msk [vmem:[%s1064_s26 + $0x48] sm:$0xf] %vm622_vm4, %v816_v9  ;;  %v515_v14 = vmax.f32 %v470_v10, 0.0 }
  0xec   : > { %v418_v13 = vpop.f32.mrf.mxu0  ;;  %v474_v17 = vpop.f32.mrf.mxu1 }
  0xed   : > { %v803_v15 = vpack.c.bf16 %v501_v11, %v501_v11  ;;  %v419_v16 = vadd.f32 %v1055_v19, %v418_v13  ;;  %v817_v20 = vpack.c.bf16 %v515_v14, %v515_v14  ;;  %v475_v21 = vadd.f32 %v1055_v19, %v474_v17 }
  0xee   : > { %v853_v18 = vpop.f32.mrf.mxu0  ;;  %v881_v23 = vpop.f32.mrf.mxu1 }
  0xef   : > { %628 = vst.msk [vmem:[%s1064_s26 + $0x14] sm:$0xf] %vm622_vm4, %v803_v15  ;;  %v502_v22 = vmax.f32 %v419_v16, 0.0  ;;  %642 = vst.msk [vmem:[%s1064_s26 + $0x4c] sm:$0xf] %vm622_vm4, %v817_v20  ;;  %v516_v25 = vmax.f32 %v475_v21, 0.0 }
  0xf0   : > { %v421_v24 = vpop.f32.mrf.mxu0  ;;  %v477_v28 = vpop.f32.mrf.mxu1 }
  0xf1   : > { %v804_v26 = vpack.c.bf16 %v502_v22, %v502_v22  ;;  %v422_v27 = vadd.f32 %v1055_v19, %v421_v24  ;;  %v818_v30 = vpack.c.bf16 %v516_v25, %v516_v25  ;;  %v478_v31 = vadd.f32 %v1055_v19, %v477_v28 }
  0xf2   : > { %v854_v29 = vpop.f32.mrf.mxu0  ;;  %v882_v33 = vpop.f32.mrf.mxu1 }
  0xf3   : > { %629 = vst.msk [vmem:[%s1064_s26 + $0x18] sm:$0xf] %vm622_vm4, %v804_v26  ;;  %v503_v32 = vmax.f32 %v422_v27, 0.0  ;;  %643 = vst.msk [vmem:[%s1064_s26 + $0x50] sm:$0xf] %vm622_vm4, %v818_v30  ;;  %v517_v35 = vmax.f32 %v478_v31, 0.0 }
  0xf4   : > { %v426_v34 = vpop.f32.mrf.mxu0  ;;  %v482_v38 = vpop.f32.mrf.mxu1 }
  0xf5   : > { %v805_v36 = vpack.c.bf16 %v503_v32, %v503_v32  ;;  %v427_v37 = vadd.f32 %v1055_v19, %v426_v34  ;;  %v819_v40 = vpack.c.bf16 %v517_v35, %v517_v35  ;;  %v483_v41 = vadd.f32 %v1055_v19, %v482_v38 }
  0xf6   : > { %v857_v39 = vpop.f32.mrf.mxu0  ;;  %v885_v43 = vpop.f32.mrf.mxu1 }
  0xf7   : > { %630 = vst.msk [vmem:[%s1064_s26 + $0x1c] sm:$0xf] %vm622_vm4, %v805_v36  ;;  %v504_v42 = vmax.f32 %v427_v37, 0.0  ;;  %644 = vst.msk [vmem:[%s1064_s26 + $0x54] sm:$0xf] %vm622_vm4, %v819_v40  ;;  %v518_v45 = vmax.f32 %v483_v41, 0.0 }
  0xf8   : > { %v429_v44 = vpop.f32.mrf.mxu0  ;;  %v485_v48 = vpop.f32.mrf.mxu1 }
  0xf9   : > { %v806_v46 = vpack.c.bf16 %v504_v42, %v504_v42  ;;  %v430_v47 = vadd.f32 %v1055_v19, %v429_v44  ;;  %v820_v50 = vpack.c.bf16 %v518_v45, %v518_v45  ;;  %v486_v51 = vadd.f32 %v1055_v19, %v485_v48 }
  0xfa   : > { %v858_v49 = vpop.f32.mrf.mxu0  ;;  %v886_v53 = vpop.f32.mrf.mxu1 }
  0xfb   : > { %631 = vst.msk [vmem:[%s1064_s26 + $0x20] sm:$0xf] %vm622_vm4, %v806_v46  ;;  %v505_v52 = vmax.f32 %v430_v47, 0.0  ;;  %645 = vst.msk [vmem:[%s1064_s26 + $0x58] sm:$0xf] %vm622_vm4, %v820_v50  ;;  %v519_v55 = vmax.f32 %v486_v51, 0.0 }
  0xfc   : > { %v434_v54 = vpop.f32.mrf.mxu0  ;;  %v490_v58 = vpop.f32.mrf.mxu1 }
  0xfd   : > { %v807_v56 = vpack.c.bf16 %v505_v52, %v505_v52  ;;  %v435_v57 = vadd.f32 %v1055_v19, %v434_v54  ;;  %v821_v60 = vpack.c.bf16 %v519_v55, %v519_v55  ;;  %v491_v61 = vadd.f32 %v1055_v19, %v490_v58 }
  0xfe   : > { %v861_v59 = vpop.f32.mrf.mxu0  ;;  %v889_v63 = vpop.f32.mrf.mxu1 }
  0xff   : > { %632 = vst.msk [vmem:[%s1064_s26 + $0x24] sm:$0xf] %vm622_vm4, %v807_v56  ;;  %v506_v62 = vmax.f32 %v435_v57, 0.0  ;;  %646 = vst.msk [vmem:[%s1064_s26 + $0x5c] sm:$0xf] %vm622_vm4, %v821_v60  ;;  %v520_v1 = vmax.f32 %v491_v61, 0.0 }
 0x100   : > { %v437_v0 = vpop.f32.mrf.mxu0  ;;  %v493_v4 = vpop.f32.mrf.mxu1 }
 0x101   : > { %v808_v2 = vpack.c.bf16 %v506_v62, %v506_v62  ;;  %v438_v3 = vadd.f32 %v1055_v19, %v437_v0  ;;  %v822_v6 = vpack.c.bf16 %v520_v1, %v520_v1 }
 0x102   : > { %v862_v5 = vpop.f32.mrf.mxu0  ;;  %v890_v8 = vpop.f32.mrf.mxu1 }
 0x103   : > { %633 = vst.msk [vmem:[%s1064_s26 + $0x28] sm:$0xf] %vm622_vm4, %v808_v2  ;;  %v507_v7 = vmax.f32 %v438_v3, 0.0 }
 0x104   : > { %648 = vst.msk [vmem:[%s1064_s26 + $0x60] sm:$0x3] %vm647_vm5, %v822_v6  ;;  %v442_v9 = vpop.f32.mrf.mxu0 }
 0x105   : > { %v809_v10 = vpack.c.bf16 %v507_v7, %v507_v7  ;;  %v443_v11 = vadd.f32 %v1055_v19, %v442_v9 }
 0x106   : > { %v865_v12 = vpop.f32.mrf.mxu0 }
 0x107   : > { %634 = vst.msk [vmem:[%s1064_s26 + $0x2c] sm:$0xf] %vm622_vm4, %v809_v10  ;;  %v508_v13 = vmax.f32 %v443_v11, 0.0 }
 0x108   : > { %v445_v14 = vpop.f32.mrf.mxu0 }
 0x109   : > { %v810_v15 = vpack.c.bf16 %v508_v13, %v508_v13  ;;  %v446_v16 = vadd.f32 %v1055_v19, %v445_v14 }
 0x10a   : > { %v866_v17 = vpop.f32.mrf.mxu0 }
 0x10b   : > { %635 = vst.msk [vmem:[%s1064_s26 + $0x30] sm:$0xf] %vm622_vm4, %v810_v15  ;;  %v509_v18 = vmax.f32 %v446_v16, 0.0 }
 0x10d   : > { %v811_v20 = vpack.c.bf16 %v509_v18, %v509_v18 }
 0x10f   : > { %636 = vst.msk [vmem:[%s1064_s26 + $0x34] sm:$0xf] %vm622_vm4, %v811_v20 }
 0x110 PF: > { %s13_s14 = sadd.s32 1, %s957_s14   ;;  %s1151_s12 = smov %s953_s13 }
 0x111   : > { %p10_p5 = scmp.ge.s32.totalorder %s13_s14, 4   ;;  %s1152_s13 = smov %s1154_s15 }
 0x113   :  { %12 = sbr.rel (!%p10_p5) target bundleno = 2 (0x2), region = 62 }

// kernel: capsnet_forward.3
= control target key start
LH: loop header
LB: loop body
LE: loop exit
PB: predicated region body
PF: predicated region fallthrough
CT: control target
= control target key end

     0   :  { %s2229_s24 = smov 0   ;;  %s2627_s0 = inlined_call_operand.vmem [shape: bf16[2,36,144], index: 0, kind: input, shape index: {}]   ;;  %s2628_s1 = inlined_call_operand.vmem [shape: bf16[2,144,8], index: 1, kind: input, shape index: {}]   ;;  %s2629_s2 = inlined_call_operand.vmem [shape: f32[2,1,8], index: 2, kind: input, shape index: {}]   ;;  %s2630_s3 = inlined_call_operand.vmem [shape: f32[8,16], index: 3, kind: input, shape index: {}]   ;;  %s2631_s4 = inlined_call_operand.vmem [shape: f32[16,10], index: 4, kind: input, shape index: {}]   ;;  %s2632_s5 = inlined_call_operand.vmem [shape: f32[1,10], index: 5, kind: input, shape index: {}]   ;;  %s2633_s6 = inlined_call_operand.vmem [shape: f32[36,36], index: 6, kind: input, shape index: {}]   ;;  %s2634_s7 = inlined_call_operand.vmem [shape: f32[2,10,1], index: 7, kind: output, shape index: {}]  }
   0x1 LB: > { %s1759_s25 = sadd.s32 4294967295, %s2184_s24   ;;  %p1763_p0 = scmp.ge.s32.totalorder %s2184_s24, 1  ;;  %s2184_s24 = sphi %s2229_s24, %s17_s24  }
   0x2   : > { %p237_p1 = scmp.lt.s32.totalorder %s2184_s24, 3 }
   0x4   : > { %p238_p2 = pnand %p1763_p0, %p237_p1 }
   0x5   : > { %p269_p3 = scmp.lt.s32.totalorder (!%p238_p2), %s1759_s25, 1 }
   0x6   : > { %241 = sbr.rel (%p238_p2) target bundleno = 2036 (0x7f4), region = 48 }
   0xb   : > { %v2080_v0 = vld [vmem:[%s2628_s1 + $0x38] sm:$0xff]   ;;  %v2186_v1 = vmov 0   ;;  %v2081_v2 = vld [vmem:[%s2628_s1 + $0x30] sm:$0xff]   ;;  %s2636_s25 = smov (!%p269_p3, %s1759_s25), 1  ;;  %v2082_v3 = vld [vmem:[%s2628_s1 + $0x28] sm:$0xff]   ;;  %vm397_vm0 = vcmask 130048  }
   0xc   : > { %407 = vmatprep.subr.bf16.mxu0 %v2186_v1  ;;  %s2068_s30 = smul.u32 40, %s2636_s25  ;;  %v2083_v4 = vld [vmem:[%s2628_s1 + $0x20] sm:$0xff]   ;;  %v2084_v6 = vld [vmem:[%s2628_s1 + $0x18] sm:$0xff]   ;;  %v2085_v7 = vld [vmem:[%s2628_s1 + $0x10] sm:$0xff]   ;;  %vm468_vm1 = vcmask 64512   ;;  %vm481_vm2 = vcmask 60416  }
   0xd   : > { %408 = vmatpush1.bf16.msra.mxu0 %v2080_v0  ;;  %v2086_v8 = vld [vmem:[%s2628_s1 + $0x8] sm:$0xff]   ;;  %v2087_v9 = vld [vmem:[%s2628_s1] sm:$0xff]   ;;  %v2098_v18 = vld [vmem:[%s2628_s1 + $0x78] sm:$0xff]   ;;  %v2187_v54 = vmov 0.0   ;;  %vm2188_vm3 = vmmov 0   ;;  %vm752_vm4 = vcmask 1043456  }
   0xe   : > { %409 = vmatprep.subr.bf16.mxu0 %v2186_v1  ;;  %s273_s12 = scalar_lea.vmem %s2627_s0, %s2068_s30  ;;  %v2088_v10 = vld [vmem:[%s2628_s1 + $0x40] sm:$0xff]   ;;  %v2099_v19 = vld [vmem:[%s2628_s1 + $0x70] sm:$0xff]   ;;  %v2100_v20 = vld [vmem:[%s2628_s1 + $0x68] sm:$0xff]   ;;  %1920 = vmatprep.subr.mxu1 %v2187_v54  ;;  %vm736_vm5 = vcmask 293888   ;;  %vm846_vm6 = vcmask 80896   ;;  %vm851_vm7 = vcmask 76800  }
   0xf   : > { %v2091_v5 = vld [vmem:[%s273_s12 + $0x4] ss:$8 sps:$4 sm:$0xff]   ;;  %v2089_v11 = vld [vmem:[%s273_s12] ss:$8 sps:$4 sm:$0xff]   ;;  %v2092_v12 = vld [vmem:[%s273_s12 + $0x14] ss:$8 sps:$4 sm:$0xff]   ;;  %1922 = vmatprep.mubr.msk.f32.mxu1 %vm2188_vm3, %v2187_v54 }
  0x10   : > { %1783 = vmatprep.mubr.msk.bf16.mxu0 %vm397_vm0, %v2091_v5  ;;  %v284_v13 = vld [vmem:[%s273_s12 + $0x20] sm:$0x33]  ;;  %v2094_v14 = vld [vmem:[%s273_s12 + $0x10] ss:$8 sps:$4 sm:$0xff]   ;;  %v2104_v24 = vld [vmem:[%s2628_s1 + $0x48] sm:$0xff]   ;;  %vm1682_vm8 = vcmask 123904  }
  0x11   : > { %410 = vmatpush1.bf16.msra.mxu0 %v2081_v2  ;;  %v1773_v15 = vcombine.high %v284_v13, %v284_v13  ;;  %v1772_v16 = vcombine.low %v284_v13, %v284_v13  ;;  %v2097_v17 = vld [vmem:[%s2628_s1 + $0x80] sm:$0xff]   ;;  %v2102_v22 = vld [vmem:[%s2628_s1 + $0x58] sm:$0xff]   ;;  %v2103_v23 = vld [vmem:[%s2628_s1 + $0x50] sm:$0xff]   ;;  %s1859_s23 = sshll.u32 %s2636_s25, 4  ;;  %vm1702_vm9 = vcmask 1024   ;;  %vm1700_vm10 = vcmask 7168  }
  0x12   : > { %411 = vmatprep.subr.bf16.mxu0 %v2186_v1  ;;  %v2101_v21 = vld [vmem:[%s2628_s1 + $0x60] sm:$0xff]   ;;  %v2105_v25 = vld [vmem:[%s2628_s1 + $0x88] sm:$0xff]   ;;  %s278_s28 = scalar_lea.vmem %s2634_s7, %s1859_s23 }
  0x13   : > { %v1767_v26 = vld [vmem:[%s2629_s2] ss:$0 sm:$0xff]  ;;  %v1822_v56 = vld [vmem:[%s2629_s2 + $0x1] ss:$0 sm:$0xff] }
  0x14   : > { %v2353_v55 = vld [vmem:[%s2630_s3] sm:$0xff] }
  0x15   : > { %412 = vmatpush1.bf16.msra.mxu0 %v2082_v3  ;;  %1921 = vmatpush3.msra.mxu1 %v2353_v55 }
  0x16   : > { %413 = vmatprep.subr.bf16.mxu0 %v2186_v1  ;;  %1937 = vmatprep.subr.mxu1 %v2187_v54 }
  0x19   : > { %414 = vmatpush1.bf16.msra.mxu0 %v2083_v4 }
  0x1a   : > { %415 = vmatprep.subr.bf16.mxu0 %v2186_v1 }
  0x1d   : > { %416 = vmatpush1.bf16.msra.mxu0 %v2084_v6 }
  0x1e   : > { %417 = vmatprep.subr.bf16.mxu0 %v2186_v1 }
  0x21   : > { %418 = vmatpush1.bf16.msra.mxu0 %v2085_v7 }
  0x22   : > { %419 = vmatprep.subr.bf16.mxu0 %v2186_v1 }
  0x25   : > { %420 = vmatpush1.bf16.msra.mxu0 %v2086_v8 }
  0x26   : > { %421 = vmatprep.subr.bf16.mxu0 %v2186_v1 }
  0x29   : > { %422 = vmatpush1.bf16.msra.mxu0 %v2087_v9 }
  0x2a   : > { %437 = vmatprep.subr.bf16.mxu0 %v2186_v1 }
  0x2d   : > { %438 = vmatpush2.bf16.msra.mxu0 %v2088_v10 }
  0x2e   : > { %980 = vmatprep.subr.bf16.mxu0 %v2186_v1 }
  0x30   : > { %440 = vmatmul.mubr.bf16.vlgmr.msra.gmra.mxu0 %v2089_v11 }
  0x31   : > { %1784 = vmatprep.mubr.msk.bf16.mxu0 %vm397_vm0, %v2092_v12  ;;  %981 = vmatpush1.bf16.msra.mxu0 %v2097_v17 }
  0x32   : > { %982 = vmatprep.subr.bf16.mxu0 %v2186_v1 }
  0x35   : > { %983 = vmatpush1.bf16.msra.mxu0 %v2098_v18 }
  0x36   : > { %984 = vmatprep.subr.bf16.mxu0 %v2186_v1 }
  0x38   : > { %448 = vmatmul.mubr.bf16.gmra.mxu0 %v2094_v14 }
  0x39   : > { %1785 = vmatprep.mubr.msk.bf16.mxu0 %vm397_vm0, %v1773_v15  ;;  %985 = vmatpush1.bf16.msra.mxu0 %v2099_v19 }
  0x3a   : > { %986 = vmatprep.subr.bf16.mxu0 %v2186_v1 }
  0x3d   : > { %987 = vmatpush1.bf16.msra.mxu0 %v2100_v20 }
  0x3e   : > { %988 = vmatprep.subr.bf16.mxu0 %v2186_v1 }
  0x40   : > { %456 = vmatmul.mubr.bf16.gmra.mxu0 %v1772_v16 }
  0x41   : > { %1832 = vmatprep.mubr.msk.bf16.mxu0 %vm397_vm0, %v2091_v5  ;;  %989 = vmatpush1.bf16.msra.mxu0 %v2101_v21 }
  0x42   : > { %990 = vmatprep.subr.bf16.mxu0 %v2186_v1 }
  0x45   : > { %991 = vmatpush1.bf16.msra.mxu0 %v2102_v22 }
  0x46   : > { %992 = vmatprep.subr.bf16.mxu0 %v2186_v1 }
  0x49   : > { %993 = vmatpush1.bf16.msra.mxu0 %v2103_v23 }
  0x4a   : > { %994 = vmatprep.subr.bf16.mxu0 %v2186_v1 }
  0x4d   : > { %995 = vmatpush1.bf16.msra.mxu0 %v2104_v24 }
  0x4e   : > { %1010 = vmatprep.subr.bf16.mxu0 %v2186_v1 }
  0x51   : > { %1011 = vmatpush2.bf16.msra.mxu0 %v2105_v25 }
  0x52   : > { %2017 = vmatprep.subr.mxu0 %v2187_v54 }
  0x54   : > { %1013 = vmatmul.mubr.bf16.vlgmr.msra.gmra.mxu0 %v2089_v11 }
  0x55   : > { %1833 = vmatprep.mubr.msk.bf16.mxu0 %vm397_vm0, %v2092_v12 }
  0x5c   : > { %1021 = vmatmul.mubr.bf16.gmra.mxu0 %v2094_v14 }
  0x5d   : > { %1834 = vmatprep.mubr.msk.bf16.mxu0 %vm397_vm0, %v1773_v15 }
  0x64   : > { %1029 = vmatmul.mubr.bf16.gmra.mxu0 %v1772_v16 }
  0x65   : > { %2027 = vmatprep.mubr.msk.f32.mxu0 %vm2188_vm3, %v2187_v54 }
  0xf0   : > { %v441_v27 = vpop.f32.mrf.mxu0 }
  0xf1   : > { %v2324_v28 = vadd.f32 %v1767_v26, %v441_v27 }
  0xf2   : > { %v443_v29 = vpop.f32.mrf.mxu0 }
  0xf3   : > { %v463_v30 = vmul.f32 %v2324_v28, %v2324_v28 }
  0xf4   : > { %v444_v31 = vpop.f32.mrf.mxu0 }
  0xf5   : > { %v2328_v32 = vadd.f32 %v1767_v26, %v444_v31  ;;  %v469_v33 = vsel %vm468_vm1, %v463_v30, 0.0 }
  0xf6   : > { %v446_v34 = vpop.f32.mrf.mxu0  ;;  %470 = vadd.xlane.f32.xlu0 %v469_v33 }
  0xf7   : > { %v464_v35 = vmul.f32 %v2328_v32, %v2328_v32 }
  0xf8   : > { %v449_v36 = vpop.f32.mrf.mxu0 }
  0xf9   : > { %v2333_v37 = vadd.f32 %v1767_v26, %v449_v36  ;;  %v472_v38 = vsel %vm468_vm1, %v464_v35, 0.0 }
  0xfa   : > { %v451_v39 = vpop.f32.mrf.mxu0  ;;  %473 = vadd.xlane.f32.xlu0 %v472_v38 }
  0xfb   : > { %v465_v40 = vmul.f32 %v2333_v37, %v2333_v37 }
  0xfc   : > { %v452_v41 = vpop.f32.mrf.mxu0 }
  0xfd   : > { %v2338_v42 = vadd.f32 %v1767_v26, %v452_v41  ;;  %v475_v43 = vsel %vm468_vm1, %v465_v40, 0.0 }
  0xfe   : > { %v454_v44 = vpop.f32.mrf.mxu0  ;;  %476 = vadd.xlane.f32.xlu1 %v475_v43 }
  0xff   : > { %v466_v45 = vmul.f32 %v2338_v42, %v2338_v42 }
 0x100   : > { %v457_v46 = vpop.f32.mrf.mxu0 }
 0x101   : > { %v2343_v47 = vadd.f32 %v1767_v26, %v457_v46  ;;  %v478_v48 = vsel %vm468_vm1, %v466_v45, 0.0  ;;  %v2394_v46 = vld [vmem:[%s2631_s4 + $0x8] sm:$0xff] }
 0x102   : > { %v459_v49 = vpop.f32.mrf.mxu0  ;;  %479 = vadd.xlane.f32.xlu1 %v478_v48 }
 0x103   : > { %v467_v50 = vmul.f32 %v2343_v47, %v2343_v47 }
 0x104   : > { %v460_v51 = vpop.f32.mrf.mxu0 }
 0x105   : > { %v482_v52 = vsel %vm481_vm2, %v467_v50, 0.0 }
 0x106   : > { %v461_v53 = vpop.f32.mrf.mxu0  ;;  %483 = vadd.xlane.f32.xlu0 %v482_v52 }
 0x114   : > { %v1014_v57 = vpop.f32.mrf.mxu0 }
 0x115   : > { %v2365_v58 = vadd.f32 %v1822_v56, %v1014_v57 }
 0x116   : > { %v1016_v59 = vpop.f32.mrf.mxu0 }
 0x117   : > { %v1036_v60 = vmul.f32 %v2365_v58, %v2365_v58 }
 0x118   : > { %v1017_v61 = vpop.f32.mrf.mxu0 }
 0x119   : > { %v2369_v62 = vadd.f32 %v1822_v56, %v1017_v61  ;;  %v1041_v63 = vsel %vm468_vm1, %v1036_v60, 0.0 }
 0x11a   : > { %v1019_v0 = vpop.f32.mrf.mxu0  ;;  %1042 = vadd.xlane.f32.xlu1 %v1041_v63 }
 0x11b   : > { %v1037_v1 = vmul.f32 %v2369_v62, %v2369_v62 }
 0x11c   : > { %v1022_v2 = vpop.f32.mrf.mxu0 }
 0x11d   : > { %v2374_v3 = vadd.f32 %v1822_v56, %v1022_v2  ;;  %v1044_v4 = vsel %vm468_vm1, %v1037_v1, 0.0 }
 0x11e   : > { %v1024_v5 = vpop.f32.mrf.mxu0  ;;  %1045 = vadd.xlane.f32.xlu0 %v1044_v4  ;;  %v2420_v4 = vld [vmem:[%s2631_s4] sm:$0xff] }
 0x11f   : > { %v1038_v6 = vmul.f32 %v2374_v3, %v2374_v3 }
 0x120   : > { %v1025_v7 = vpop.f32.mrf.mxu0 }
 0x121   : > { %v2379_v8 = vadd.f32 %v1822_v56, %v1025_v7  ;;  %v1047_v9 = vsel %vm468_vm1, %v1038_v6, 0.0 }
 0x122   : > { %v1027_v10 = vpop.f32.mrf.mxu0  ;;  %1048 = vadd.xlane.f32.xlu1 %v1047_v9 }
 0x123   : > { %v1039_v11 = vmul.f32 %v2379_v8, %v2379_v8 }
 0x124   : > { %v1030_v12 = vpop.f32.mrf.mxu0 }
 0x125   : > { %v1050_v13 = vsel %vm468_vm1, %v1039_v11, 0.0  ;;  %v2385_v14 = vadd.f32 %v1822_v56, %v1030_v12 }
 0x126   : > { %1051 = vadd.xlane.f32.xlu0 %v1050_v13  ;;  %v1032_v15 = vpop.f32.mrf.mxu0 }
 0x127   : > { %v1040_v16 = vmul.f32 %v2385_v14, %v2385_v14 }
 0x128   : > { %v1033_v18 = vpop.f32.mrf.mxu0 }
 0x129   : > { %v1053_v21 = vsel %vm481_vm2, %v1040_v16, 0.0 }
 0x12a   : > { %1054 = vadd.xlane.f32.xlu1 %v1053_v21  ;;  %v1034_v22 = vpop.f32.mrf.mxu0 }
 0x17f   : > { %v471_v17 = vpop.xlane.xlu0 %470 }
 0x180   : > { %v485_v19 = vadd.f32 1e-12, %v471_v17  ;;  %v500_v20 = vadd.f32 1.0, %v471_v17 }
 0x182   : > { %2106 = vrsqrt.f32 %v485_v19 }
 0x183   : > { %v474_v23 = vpop.xlane.xlu0 %473  ;;  %2108 = vrcp.f32 %v500_v20 }
 0x184   : > { %v486_v24 = vadd.f32 1e-12, %v474_v23  ;;  %v501_v25 = vadd.f32 1.0, %v474_v23 }
 0x186   : > { %2110 = vrsqrt.f32 %v486_v24 }
 0x187   : > { %v477_v26 = vpop.xlane.xlu1 %476  ;;  %2112 = vrcp.f32 %v501_v25 }
 0x188   : > { %v487_v27 = vadd.f32 1e-12, %v477_v26  ;;  %v502_v29 = vadd.f32 1.0, %v477_v26 }
 0x18a   : > { %2114 = vrsqrt.f32 %v487_v27 }
 0x18b   : > { %v480_v30 = vpop.xlane.xlu1 %479  ;;  %2116 = vrcp.f32 %v502_v29 }
 0x18c   : > { %v488_v31 = vadd.f32 1e-12, %v480_v30  ;;  %v503_v33 = vadd.f32 1.0, %v480_v30 }
 0x18e   : > { %2118 = vrsqrt.f32 %v488_v31 }
 0x18f   : > { %v2107_v34 = vpop.eup %2106  ;;  %v484_v35 = vpop.xlane.xlu0 %483  ;;  %2120 = vrcp.f32 %v503_v33 }
 0x190   : > { %v495_v36 = vmul.f32 %v2107_v34, %v471_v17  ;;  %v489_v38 = vadd.f32 1e-12, %v484_v35  ;;  %v504_v39 = vadd.f32 1.0, %v484_v35  ;;  %v2109_v40 = vpop.eup %2108  ;;  %v2461_v34 = vld [vmem:[%s2633_s6] sm:$0xff] }
 0x192   : > { %v510_v41 = vmul.f32 %v2109_v40, %v495_v36  ;;  %2122 = vrsqrt.f32 %v489_v38 }
 0x193   : > { %v2111_v43 = vpop.eup %2110  ;;  %2124 = vrcp.f32 %v504_v39  ;;  %v2472_v39 = vld [vmem:[%s2633_s6 + $0x8] sm:$0xff] }
 0x194   : > { %v496_v44 = vmul.f32 %v2111_v43, %v474_v23  ;;  %v515_v45 = vmul.f32 %v510_v41, %v2324_v28  ;;  %v2113_v48 = vpop.eup %2112 }
 0x196   : > { %v511_v49 = vmul.f32 %v2113_v48, %v496_v44  ;;  %1923 = vmatmul.mubr.msk.f32.vlgmr.msra.gmra.mxu1 %vm468_vm1, %v515_v45  ;;  %v2483_v44 = vld [vmem:[%s2633_s6 + $0x10] sm:$0xff]  ;;  %v2492_v48 = vld [vmem:[%s2633_s6 + $0x18] sm:$0xff] }
 0x197   : > { %v2115_v50 = vpop.eup %2114  ;;  %1925 = vmatprep.mubr.msk.f32.mxu1 %vm2188_vm3, %v2187_v54  ;;  %1938 = vmatpush3.msra.mxu1 %v2394_v46 }
 0x198   : > { %v497_v51 = vmul.f32 %v2115_v50, %v477_v26  ;;  %v516_v52 = vmul.f32 %v511_v49, %v2328_v32  ;;  %1939 = vmatprep.subr.mxu1 %v2187_v54  ;;  %v2117_v28 = vpop.eup %2116 }
 0x199   : > { %1940 = vmatpush3.msra.mxu1 %v2420_v4 }
 0x19a   : > { %v512_v53 = vmul.f32 %v2117_v28, %v497_v51  ;;  %1926 = vmatmul.mubr.msk.f32.gmra.mxu1 %vm468_vm1, %v516_v52  ;;  %1956 = vmatprep.subr.mxu1 %v2187_v54  ;;  %v2501_v28 = vld [vmem:[%s2633_s6 + $0x20] sm:$0xf] }
 0x19b   : > { %v2119_v56 = vpop.eup %2118  ;;  %1928 = vmatprep.mubr.msk.f32.mxu1 %vm2188_vm3, %v2187_v54 }
 0x19c   : > { %v498_v57 = vmul.f32 %v2119_v56, %v480_v30  ;;  %v517_v59 = vmul.f32 %v512_v53, %v2333_v37  ;;  %v2121_v60 = vpop.eup %2120 }
 0x19e   : > { %v513_v61 = vmul.f32 %v2121_v60, %v498_v57  ;;  %1929 = vmatmul.mubr.msk.f32.gmra.mxu1 %vm468_vm1, %v517_v59 }
 0x19f   : > { %v2123_v63 = vpop.eup %2122  ;;  %1931 = vmatprep.mubr.msk.f32.mxu1 %vm2188_vm3, %v2187_v54 }
 0x1a0   : > { %v499_v32 = vmul.f32 %v2123_v63, %v484_v35  ;;  %v518_v0 = vmul.f32 %v513_v61, %v2338_v42  ;;  %v2125_v1 = vpop.eup %2124 }
 0x1a2   : > { %v514_v2 = vmul.f32 %v2125_v1, %v499_v32  ;;  %1932 = vmatmul.mubr.msk.f32.gmra.mxu1 %vm468_vm1, %v518_v0 }
 0x1a3   : > { %1934 = vmatprep.mubr.msk.f32.mxu1 %vm2188_vm3, %v2187_v54  ;;  %v1043_v22 = vpop.xlane.xlu1 %1042 }
 0x1a4   : > { %v519_v37 = vmul.f32 %v514_v2, %v2343_v47  ;;  %v1056_v24 = vadd.f32 1e-12, %v1043_v22  ;;  %v1071_v29 = vadd.f32 1.0, %v1043_v22 }
 0x1a6   : > { %1935 = vmatmul.mubr.msk.f32.gmra.mxu1 %vm468_vm1, %v519_v37  ;;  %2126 = vrsqrt.f32 %v1056_v24 }
 0x1a7   : > { %1941 = vmatprep.mubr.msk.f32.mxu1 %vm2188_vm3, %v2187_v54  ;;  %v1046_v26 = vpop.xlane.xlu0 %1045  ;;  %2128 = vrcp.f32 %v1071_v29 }
 0x1a8   : > { %v1057_v30 = vadd.f32 1e-12, %v1046_v26  ;;  %v1072_v33 = vadd.f32 1.0, %v1046_v26 }
 0x1aa   : > { %2130 = vrsqrt.f32 %v1057_v30 }
 0x1ab   : > { %v1049_v31 = vpop.xlane.xlu1 %1048  ;;  %2132 = vrcp.f32 %v1072_v33 }
 0x1ac   : > { %v1058_v35 = vadd.f32 1e-12, %v1049_v31  ;;  %v1073_v38 = vadd.f32 1.0, %v1049_v31 }
 0x1ae   : > { %2134 = vrsqrt.f32 %v1058_v35 }
 0x1af   : > { %v1052_v36 = vpop.xlane.xlu0 %1051  ;;  %2136 = vrcp.f32 %v1073_v38 }
 0x1b0   : > { %v1059_v40 = vadd.f32 1e-12, %v1052_v36  ;;  %v1074_v43 = vadd.f32 1.0, %v1052_v36 }
 0x1b2   : > { %2138 = vrsqrt.f32 %v1059_v40 }
 0x1b3   : > { %v1055_v41 = vpop.xlane.xlu1 %1054  ;;  %v2127_v45 = vpop.eup %2126  ;;  %2140 = vrcp.f32 %v1074_v43 }
 0x1b4   : > { %v2129_v49 = vpop.eup %2128  ;;  %v1066_v50 = vmul.f32 %v2127_v45, %v1043_v22  ;;  %v1075_v51 = vadd.f32 1.0, %v1055_v41 }
 0x1b6   : > { %v1081_v56 = vmul.f32 %v2129_v49, %v1066_v50 }
 0x1b7   : > { %v2131_v52 = vpop.eup %2130 }
 0x1b8   : > { %v2133_v53 = vpop.eup %2132  ;;  %v1067_v57 = vmul.f32 %v2131_v52, %v1046_v26  ;;  %v1086_v61 = vmul.f32 %v1081_v56, %v2365_v58 }
 0x1ba   : > { %v1082_v63 = vmul.f32 %v2133_v53, %v1067_v57 }
 0x1bb   : > { %v2135_v59 = vpop.eup %2134 }
 0x1bc   : > { %v2137_v60 = vpop.eup %2136  ;;  %v1068_v32 = vmul.f32 %v2135_v59, %v1049_v31 }
 0x1be   : > { %v1083_v2 = vmul.f32 %v2137_v60, %v1068_v32 }
 0x1bf   : > { %v2139_v0 = vpop.eup %2138 }
 0x1c0   : > { %v2141_v1 = vpop.eup %2140  ;;  %v1069_v37 = vmul.f32 %v2139_v0, %v1052_v36 }
 0x1c2   : > { %v1084_v58 = vmul.f32 %v2141_v1, %v1069_v37 }
 0x256   : > { %v2424_v42 = vpop.f32.mrf.mxu1 }
 0x257   : > { %1942 = vmatmul.mubr.msk.f32.vlgmr.msra.gmra.mxu1 %vm397_vm0, %v2424_v42 }
 0x258   : > { %v1924_v47 = vpop.f32.mrf.mxu1  ;;  %1944 = vmatprep.mubr.msk.f32.mxu1 %vm2188_vm3, %v2187_v54 }
 0x259   : > { %v1087_v47 = vmul.f32 %v1082_v63, %v2369_v62 }
 0x25a   : > { %v2430_v5 = vpop.f32.mrf.mxu1 }
 0x25b   : > { %1945 = vmatmul.mubr.msk.f32.gmra.mxu1 %vm397_vm0, %v2430_v5 }
 0x25c   : > { %v1927_v6 = vpop.f32.mrf.mxu1  ;;  %1947 = vmatprep.mubr.msk.f32.mxu1 %vm2188_vm3, %v2187_v54 }
 0x25e   : > { %v2436_v7 = vpop.f32.mrf.mxu1 }
 0x25f   : > { %1948 = vmatmul.mubr.msk.f32.gmra.mxu1 %vm397_vm0, %v2436_v7 }
 0x260   : > { %v1930_v9 = vpop.f32.mrf.mxu1  ;;  %1950 = vmatprep.mubr.msk.f32.mxu1 %vm2188_vm3, %v2187_v54 }
 0x262   : > { %v2442_v10 = vpop.f32.mrf.mxu1 }
 0x263   : > { %1951 = vmatmul.mubr.msk.f32.gmra.mxu1 %vm397_vm0, %v2442_v10 }
 0x264   : > { %v1933_v11 = vpop.f32.mrf.mxu1  ;;  %1953 = vmatprep.mubr.msk.f32.mxu1 %vm2188_vm3, %v2187_v54 }
 0x265   : > { %v1088_v11 = vmul.f32 %v1083_v2, %v2374_v3 }
 0x266   : > { %v2448_v12 = vpop.f32.mrf.mxu1 }
 0x267   : > { %1954 = vmatmul.mubr.msk.f32.gmra.mxu1 %vm397_vm0, %v2448_v12 }
 0x268   : > { %v1936_v13 = vpop.f32.mrf.mxu1  ;;  %1966 = vmatprep.mubr.msk.f32.mxu1 %vm2188_vm3, %v2187_v54 }
 0x269   : > { %v1089_v13 = vmul.f32 %v1084_v58, %v2379_v8  ;;  %v2533_v8 = vld [vmem:[%s2632_s5] ss:$0 sm:$0xff] }
 0x317   : > { %v706_v15 = vpop.f32.mrf.mxu1 }
 0x319   : > { %v1943_v16 = vpop.f32.mrf.mxu1 }
 0x31b   : > { %v711_v17 = vpop.f32.mrf.mxu1 }
 0x31d   : > { %v1946_v18 = vpop.f32.mrf.mxu1 }
 0x31f   : > { %v716_v19 = vpop.f32.mrf.mxu1 }
 0x321   : > { %v1949_v20 = vpop.f32.mrf.mxu1 }
 0x323   : > { %v721_v21 = vpop.f32.mrf.mxu1 }
 0x325   : > { %v1952_v23 = vpop.f32.mrf.mxu1 }
 0x327   : > { %v726_v25 = vpop.f32.mrf.mxu1 }
 0x328   : > { %1957 = vmatpush3.msk.msra.mxu1 %vm752_vm4, %v726_v25 }
 0x329   : > { %v1955_v27 = vpop.f32.mrf.mxu1  ;;  %1958 = vmatprep.subr.mxu1 %v2187_v54 }
 0x32a   : > { %1959 = vmatpush3.msra.mxu1 %v721_v21 }
 0x32b   : > { %1960 = vmatprep.subr.mxu1 %v2187_v54 }
 0x32c   : > { %1961 = vmatpush3.msra.mxu1 %v716_v19 }
 0x32d   : > { %1962 = vmatprep.subr.mxu1 %v2187_v54 }
 0x32e   : > { %1963 = vmatpush3.msra.mxu1 %v711_v17 }
 0x32f   : > { %1964 = vmatprep.subr.mxu1 %v2187_v54 }
 0x330   : > { %1965 = vmatpush3.msra.mxu1 %v706_v15 }
 0x331   : > { %1967 = vmatmul.mubr.msk.f32.vlgmr.msra.gmra.mxu1 %vm736_vm5, %v2461_v34  ;;  %1981 = vmatprep.subr.mxu1 %v2187_v54 }
 0x332   : > { %1969 = vmatprep.mubr.msk.f32.mxu1 %vm2188_vm3, %v2187_v54  ;;  %1982 = vmatpush3.msra.mxu1 %v2353_v55  ;;  %v1060_v55 = vadd.f32 1e-12, %v1055_v41 }
 0x333   : > { %1998 = vmatprep.subr.mxu1 %v2187_v54 }
 0x334   : > { %2142 = vrsqrt.f32 %v1060_v55 }
 0x335   : > { %1970 = vmatmul.mubr.msk.f32.gmra.mxu1 %vm736_vm5, %v2472_v39  ;;  %2144 = vrcp.f32 %v1075_v51 }
 0x336   : > { %1972 = vmatprep.mubr.msk.f32.mxu1 %vm2188_vm3, %v2187_v54 }
 0x339   : > { %1973 = vmatmul.mubr.msk.f32.gmra.mxu1 %vm736_vm5, %v2483_v44 }
 0x33a   : > { %1975 = vmatprep.mubr.msk.f32.mxu1 %vm2188_vm3, %v2187_v54 }
 0x33d   : > { %1976 = vmatmul.mubr.msk.f32.gmra.mxu1 %vm736_vm5, %v2492_v48 }
 0x33e   : > { %1978 = vmatprep.mubr.msk.f32.mxu1 %vm2188_vm3, %v2187_v54 }
 0x341   : > { %1979 = vmatmul.mubr.msk.f32.gmra.mxu1 %vm736_vm5, %v2501_v28  ;;  %v2143_v6 = vpop.eup %2142 }
 0x342   : > { %1983 = vmatprep.mubr.msk.f32.mxu1 %vm2188_vm3, %v2187_v54  ;;  %v1070_v9 = vmul.f32 %v2143_v6, %v1055_v41 }
 0x345   : > { %1984 = vmatmul.mubr.msk.f32.vlgmr.msra.gmra.mxu1 %vm468_vm1, %v1086_v61 }
 0x346   : > { %1986 = vmatprep.mubr.msk.f32.mxu1 %vm2188_vm3, %v2187_v54  ;;  %1999 = vmatpush3.msra.mxu1 %v2394_v46  ;;  %v2145_v46 = vpop.eup %2144 }
 0x347   : > { %2000 = vmatprep.subr.mxu1 %v2187_v54  ;;  %v1085_v62 = vmul.f32 %v2145_v46, %v1070_v9 }
 0x348   : > { %2001 = vmatpush3.msra.mxu1 %v2420_v4 }
 0x349   : > { %1987 = vmatmul.mubr.msk.f32.gmra.mxu1 %vm468_vm1, %v1087_v47  ;;  %v1090_v4 = vmul.f32 %v1085_v62, %v2385_v14 }
 0x34a   : > { %1989 = vmatprep.mubr.msk.f32.mxu1 %vm2188_vm3, %v2187_v54 }
 0x34d   : > { %1990 = vmatmul.mubr.msk.f32.gmra.mxu1 %vm468_vm1, %v1088_v11 }
 0x34e   : > { %1992 = vmatprep.mubr.msk.f32.mxu1 %vm2188_vm3, %v2187_v54 }
 0x351   : > { %1993 = vmatmul.mubr.msk.f32.gmra.mxu1 %vm468_vm1, %v1089_v13 }
 0x352   : > { %1995 = vmatprep.mubr.msk.f32.mxu1 %vm2188_vm3, %v2187_v54 }
 0x355   : > { %1996 = vmatmul.mubr.msk.f32.gmra.mxu1 %vm468_vm1, %v1090_v4 }
 0x356   : > { %2002 = vmatprep.mubr.msk.f32.mxu1 %vm2188_vm3, %v2187_v54 }
 0x3f1   : > { %v822_v3 = vpop.f32.mrf.mxu1 }
 0x3f2   : > { %v823_v14 = vadd.f32 %v2533_v8, %v822_v3 }
 0x3f3   : > { %v1968_v15 = vpop.f32.mrf.mxu1 }
 0x3f4   : > { %v847_v29 = vsel %vm846_vm6, %v823_v14, -inf }
 0x3f5   : > { %v827_v16 = vpop.f32.mrf.mxu1 }
 0x3f6   : > { %v828_v24 = vadd.f32 %v2533_v8, %v827_v16 }
 0x3f7   : > { %v1971_v17 = vpop.f32.mrf.mxu1 }
 0x3f8   : > { %v848_v36 = vsel %vm846_vm6, %v828_v24, -inf }
 0x3f9   : > { %v832_v18 = vpop.f32.mrf.mxu1 }
 0x3fa   : > { %v833_v25 = vadd.f32 %v2533_v8, %v832_v18 }
 0x3fb   : > { %v1974_v19 = vpop.f32.mrf.mxu1 }
 0x3fc   : > { %v849_v38 = vsel %vm846_vm6, %v833_v25, -inf }
 0x3fd   : > { %v837_v20 = vpop.f32.mrf.mxu1 }
 0x3fe   : > { %v838_v22 = vadd.f32 %v2533_v8, %v837_v20 }
 0x3ff   : > { %v1977_v21 = vpop.f32.mrf.mxu1 }
 0x400   : > { %v850_v30 = vsel %vm846_vm6, %v838_v22, -inf }
 0x401   : > { %v842_v23 = vpop.f32.mrf.mxu1  ;;  %v855_v40 = vmax.f32 %v849_v38, %v850_v30 }
 0x402   : > { %v843_v26 = vadd.f32 %v2533_v8, %v842_v23 }
 0x403   : > { %v1980_v27 = vpop.f32.mrf.mxu1 }
 0x404   : > { %v852_v31 = vsel %vm851_vm7, %v843_v26, -inf }
 0x405   : > { %v853_v33 = vmax.f32 %v847_v29, %v852_v31  ;;  %v1172_v35 = vpop.f32.mrf.mxu1 }
 0x406   : > { %2003 = vmatmul.mubr.msk.f32.vlgmr.msra.gmra.mxu1 %vm397_vm0, %v1172_v35 }
 0x407   : > { %v854_v41 = vmax.f32 %v853_v33, %v848_v36  ;;  %v1985_v43 = vpop.f32.mrf.mxu1  ;;  %2005 = vmatprep.mubr.msk.f32.mxu1 %vm2188_vm3, %v2187_v54 }
 0x409   : > { %v856_v55 = vmax.f32 %v854_v41, %v855_v40  ;;  %v1177_v45 = vpop.f32.mrf.mxu1 }
 0x40a   : > { %2006 = vmatmul.mubr.msk.f32.gmra.mxu1 %vm397_vm0, %v1177_v45 }
 0x40b   : > { %v857_v49 = vrot.slane %v856_v55, 4  ;;  %v1988_v50 = vpop.f32.mrf.mxu1  ;;  %2008 = vmatprep.mubr.msk.f32.mxu1 %vm2188_vm3, %v2187_v54 }
 0x40d   : > { %v858_v51 = vmax.f32 %v856_v55, %v857_v49  ;;  %v1182_v52 = vpop.f32.mrf.mxu1 }
 0x40e   : > { %2009 = vmatmul.mubr.msk.f32.gmra.mxu1 %vm397_vm0, %v1182_v52 }
 0x40f   : > { %v859_v53 = vrot.slane %v858_v51, 2  ;;  %v1991_v56 = vpop.f32.mrf.mxu1  ;;  %2011 = vmatprep.mubr.msk.f32.mxu1 %vm2188_vm3, %v2187_v54 }
 0x411   : > { %v860_v57 = vmax.f32 %v858_v51, %v859_v53  ;;  %v1187_v59 = vpop.f32.mrf.mxu1 }
 0x412   : > { %2012 = vmatmul.mubr.msk.f32.gmra.mxu1 %vm397_vm0, %v1187_v59 }
 0x413   : > { %v861_v60 = vrot.slane %v860_v57, 1  ;;  %v1994_v61 = vpop.f32.mrf.mxu1  ;;  %2014 = vmatprep.mubr.msk.f32.mxu1 %vm2188_vm3, %v2187_v54 }
 0x415   : > { %v862_v63 = vmax.f32 %v860_v57, %v861_v60  ;;  %v1192_v32 = vpop.f32.mrf.mxu1 }
 0x416   : > { %2015 = vmatmul.mubr.msk.f32.gmra.mxu1 %vm397_vm0, %v1192_v32  ;;  %2042 = vmatprep.subr.msk.mxu1 %vm752_vm4, %v1192_v32 }
 0x417   : > { %v863_v0 = vsub.f32 %v823_v14, %v862_v63  ;;  %v864_v1 = vsub.f32 %v828_v24, %v862_v63  ;;  %v865_v2 = vsub.f32 %v833_v25, %v862_v63  ;;  %v866_v37 = vsub.f32 %v838_v22, %v862_v63  ;;  %v1997_v47 = vpop.f32.mrf.mxu1  ;;  %2043 = vmatpush3.msk.msra.mxu1 %vm752_vm4, %v1192_v32 }
 0x418   : > { %v867_v6 = vsub.f32 %v843_v26, %v862_v63  ;;  %2044 = vmatprep.subr.mxu1 %v1187_v59 }
 0x419   : > { %v868_v58 = vmul.f32 1.442695, %v863_v0  ;;  %v870_v9 = vmul.f32 1.442695, %v864_v1  ;;  %v872_v11 = vmul.f32 1.442695, %v865_v2  ;;  %2045 = vmatpush3.msra.mxu1 %v1187_v59 }
 0x41a   : > { %v874_v46 = vmul.f32 1.442695, %v866_v37  ;;  %2046 = vmatprep.subr.mxu1 %v1182_v52  ;;  %v876_v62 = vmul.f32 1.442695, %v867_v6 }
 0x41b   : > { %2146 = vpow2.f32 %v868_v58  ;;  %2047 = vmatpush3.msra.mxu1 %v1182_v52 }
 0x41c   : > { %2148 = vpow2.f32 %v870_v9  ;;  %2048 = vmatprep.subr.mxu1 %v1177_v45 }
 0x41d   : > { %2150 = vpow2.f32 %v872_v11  ;;  %2049 = vmatpush3.msra.mxu1 %v1177_v45 }
 0x41e   : > { %2152 = vpow2.f32 %v874_v46  ;;  %2050 = vmatprep.subr.mxu1 %v1172_v35 }
 0x41f   : > { %2051 = vmatpush3.msra.mxu1 %v1172_v35  ;;  %2154 = vpow2.f32 %v876_v62 }
 0x420   : > { %2055 = vmatprep.subr.msk.mxu1 %vm752_vm4, %v2448_v12 }
 0x428   : > { %v2147_v13 = vpop.eup %2146 }
 0x429   : > { %v2149_v4 = vpop.eup %2148  ;;  %v878_v3 = vsel %vm846_vm6, %v2147_v13, 0.0 }
 0x42a   : > { %v2151_v15 = vpop.eup %2150  ;;  %v879_v16 = vsel %vm846_vm6, %v2149_v4, 0.0 }
 0x42b   : > { %v2153_v17 = vpop.eup %2152  ;;  %v880_v18 = vadd.f32 %v879_v16, %v878_v3  ;;  %v881_v19 = vsel %vm846_vm6, %v2151_v15, 0.0 }
 0x42c   : > { %v2155_v20 = vpop.eup %2154  ;;  %v883_v14 = vsel %vm846_vm6, %v2153_v17, 0.0 }
 0x42d   : > { %v882_v21 = vadd.f32 %v881_v19, %v880_v18  ;;  %v885_v23 = vsel %vm851_vm7, %v2155_v20, 0.0 }
 0x42f   : > { %v884_v22 = vadd.f32 %v883_v14, %v882_v21 }
 0x431   : > { %v886_v24 = vadd.f32 %v885_v23, %v884_v22 }
 0x433   : > { %v887_v25 = vrot.slane %v886_v24, 4 }
 0x435   : > { %v888_v26 = vadd.f32 %v887_v25, %v886_v24 }
 0x437   : > { %v889_v27 = vrot.slane %v888_v26, 2 }
 0x439   : > { %v890_v29 = vadd.f32 %v889_v27, %v888_v26 }
 0x43b   : > { %v891_v30 = vrot.slane %v890_v29, 1 }
 0x43d   : > { %v892_v31 = vadd.f32 %v891_v30, %v890_v29 }
 0x43f   : > { %2156 = vrcp.f32 %v892_v31 }
 0x44c   : > { %v2157_v33 = vpop.eup %2156 }
 0x44d   : > { %v894_v35 = vmul.f32 %v2157_v33, %v2147_v13  ;;  %v895_v36 = vmul.f32 %v2157_v33, %v2149_v4  ;;  %v896_v38 = vmul.f32 %v2157_v33, %v2151_v15  ;;  %v897_v40 = vmul.f32 %v2157_v33, %v2153_v17 }
 0x44e   : > { %v898_v41 = vmul.f32 %v2157_v33, %v2155_v20 }
 0x44f   : > { %1560 = vxpose.xlu1.b32.start [1/5] (short) (narrow) %v894_v35, 16 }
 0x453   : > { %1561 = vxpose.xlu1.b32.cont [2/5] (short) (narrow) %v895_v36, 16 }
 0x457   : > { %1562 = vxpose.xlu1.b32.cont [3/5] (short) (narrow) %v896_v38, 16 }
 0x45b   : > { %1563 = vxpose.xlu1.b32.cont [4/5] (short) (narrow) %v897_v40, 16 }
 0x45f   : > { %1564 = vxpose.xlu1.b32.end [5/5] (short) (narrow) %v898_v41, 16 }
 0x4c6   : > { %v1277_v43 = vpop.f32.mrf.mxu1 }
 0x4c8   : > { %v2004_v55 = vpop.f32.mrf.mxu1 }
 0x4ca   : > { %v1282_v45 = vpop.f32.mrf.mxu1 }
 0x4cc   : > { %v2007_v49 = vpop.f32.mrf.mxu1 }
 0x4ce   : > { %v1287_v50 = vpop.f32.mrf.mxu1 }
 0x4d0   : > { %v2010_v51 = vpop.f32.mrf.mxu1 }
 0x4d2   : > { %v1292_v52 = vpop.f32.mrf.mxu1 }
 0x4d4   : > { %v2013_v53 = vpop.f32.mrf.mxu1 }
 0x4d6   : > { %v1297_v56 = vpop.f32.mrf.mxu1 }
 0x4d7   : > { %2018 = vmatpush3.msk.msra.mxu0 %vm752_vm4, %v1297_v56 }
 0x4d8   : > { %v2016_v57 = vpop.f32.mrf.mxu1  ;;  %2019 = vmatprep.subr.mxu0 %v2187_v54 }
 0x4d9   : > { %2020 = vmatpush3.msra.mxu0 %v1292_v52 }
 0x4da   : > { %2021 = vmatprep.subr.mxu0 %v2187_v54 }
 0x4db   : > { %2022 = vmatpush3.msra.mxu0 %v1287_v50 }
 0x4dc   : > { %2023 = vmatprep.subr.mxu0 %v2187_v54 }
 0x4dd   : > { %2024 = vmatpush3.msra.mxu0 %v1282_v45 }
 0x4de   : > { %2025 = vmatprep.subr.mxu0 %v2187_v54 }
 0x4df   : > { %2026 = vmatpush3.msra.mxu0 %v1277_v43 }
 0x4e0   : > { %2028 = vmatmul.mubr.msk.f32.vlgmr.msra.gmra.mxu0 %vm736_vm5, %v2461_v34 }
 0x4e1   : > { %2030 = vmatprep.mubr.msk.f32.mxu0 %vm2188_vm3, %v2187_v54 }
 0x4e4   : > { %2031 = vmatmul.mubr.msk.f32.gmra.mxu0 %vm736_vm5, %v2472_v39 }
 0x4e5   : > { %2033 = vmatprep.mubr.msk.f32.mxu0 %vm2188_vm3, %v2187_v54 }
 0x4e8   : > { %2034 = vmatmul.mubr.msk.f32.gmra.mxu0 %vm736_vm5, %v2483_v44 }
 0x4e9   : > { %2036 = vmatprep.mubr.msk.f32.mxu0 %vm2188_vm3, %v2187_v54 }
 0x4ec   : > { %2037 = vmatmul.mubr.msk.f32.gmra.mxu0 %vm736_vm5, %v2492_v48 }
 0x4ed   : > { %2039 = vmatprep.mubr.msk.f32.mxu0 %vm2188_vm3, %v2187_v54 }
 0x4f0   : > { %2040 = vmatmul.mubr.msk.f32.gmra.mxu0 %vm736_vm5, %v2501_v28 }
 0x5a0   : > { %v1370_v34 = vpop.f32.mrf.mxu0 }
 0x5a1   : > { %v1371_v0 = vadd.f32 %v2533_v8, %v1370_v34 }
 0x5a2   : > { %v2029_v39 = vpop.f32.mrf.mxu0 }
 0x5a3   : > { %v1394_v47 = vsel %vm846_vm6, %v1371_v0, -inf }
 0x5a4   : > { %v1375_v59 = vpop.f32.mrf.mxu0 }
 0x5a5   : > { %v1376_v48 = vadd.f32 %v2533_v8, %v1375_v59 }
 0x5a6   : > { %v2032_v60 = vpop.f32.mrf.mxu0 }
 0x5a7   : > { %v1395_v11 = vsel %vm846_vm6, %v1376_v48, -inf }
 0x5a8   : > { %v1380_v61 = vpop.f32.mrf.mxu0 }
 0x5a9   : > { %v1381_v54 = vadd.f32 %v2533_v8, %v1380_v61 }
 0x5aa   : > { %v2035_v63 = vpop.f32.mrf.mxu0 }
 0x5ab   : > { %v1396_v46 = vsel %vm846_vm6, %v1381_v54, -inf }
 0x5ac   : > { %v1385_v32 = vpop.f32.mrf.mxu0 }
 0x5ad   : > { %v1386_v1 = vadd.f32 %v2533_v8, %v1385_v32 }
 0x5ae   : > { %v2038_v44 = vpop.f32.mrf.mxu0 }
 0x5af   : > { %v1397_v6 = vsel %vm846_vm6, %v1386_v1, -inf }
 0x5b0   : > { %v1390_v2 = vpop.f32.mrf.mxu0  ;;  %v1401_v62 = vmax.f32 %v1396_v46, %v1397_v6 }
 0x5b1   : > { %v1391_v37 = vadd.f32 %v2533_v8, %v1390_v2 }
 0x5b2   : > { %v2041_v28 = vpop.f32.mrf.mxu0 }
 0x5b3   : > { %v1398_v58 = vsel %vm851_vm7, %v1391_v37, -inf }
 0x5b4   : > { %v1399_v9 = vmax.f32 %v1394_v47, %v1398_v58 }
 0x5b6   : > { %v1400_v13 = vmax.f32 %v1399_v9, %v1395_v11 }
 0x5b8   : > { %v1402_v4 = vmax.f32 %v1400_v13, %v1401_v62 }
 0x5ba   : > { %v1403_v3 = vrot.slane %v1402_v4, 4 }
 0x5bc   : > { %v1404_v15 = vmax.f32 %v1402_v4, %v1403_v3 }
 0x5be   : > { %v1405_v16 = vrot.slane %v1404_v15, 2 }
 0x5c0   : > { %v1406_v17 = vmax.f32 %v1404_v15, %v1405_v16 }
 0x5c2   : > { %v1407_v8 = vrot.slane %v1406_v17, 1 }
 0x5c4   : > { %v1408_v18 = vmax.f32 %v1406_v17, %v1407_v8 }
 0x5c6   : > { %v1410_v19 = vsub.f32 %v1376_v48, %v1408_v18  ;;  %v1411_v20 = vsub.f32 %v1381_v54, %v1408_v18  ;;  %v1409_v21 = vsub.f32 %v1371_v0, %v1408_v18  ;;  %v1412_v14 = vsub.f32 %v1386_v1, %v1408_v18  ;;  %v1576_v0 = vpop.trf.xlu1 }
 0x5c7   : > { %v1413_v24 = vsub.f32 %v1391_v37, %v1408_v18 }
 0x5c8   : > { %v1416_v22 = vmul.f32 1.442695, %v1410_v19  ;;  %v1418_v23 = vmul.f32 1.442695, %v1411_v20  ;;  %v1414_v25 = vmul.f32 1.442695, %v1409_v21 }
 0x5c9   : > { %v1420_v26 = vmul.f32 1.442695, %v1412_v14  ;;  %v1422_v27 = vmul.f32 1.442695, %v1413_v24 }
 0x5ca   : > { %2158 = vpow2.f32 %v1416_v22  ;;  %v1577_v2 = vpop.trf.xlu1 }
 0x5cb   : > { %2160 = vpow2.f32 %v1418_v23 }
 0x5cc   : > { %2162 = vpow2.f32 %v1414_v25 }
 0x5cd   : > { %2164 = vpow2.f32 %v1420_v26 }
 0x5ce   : > { %2166 = vpow2.f32 %v1422_v27 }
 0x5d7   : > { %v2159_v29 = vpop.eup %2158 }
 0x5d8   : > { %v2161_v30 = vpop.eup %2160  ;;  %v1425_v31 = vsel %vm846_vm6, %v2159_v29, 0.0 }
 0x5d9   : > { %v2163_v33 = vpop.eup %2162  ;;  %v1427_v40 = vsel %vm846_vm6, %v2161_v30, 0.0 }
 0x5da   : > { %v1424_v35 = vsel %vm846_vm6, %v2163_v33, 0.0  ;;  %v2165_v36 = vpop.eup %2164 }
 0x5db   : > { %v1426_v38 = vadd.f32 %v1425_v31, %v1424_v35  ;;  %v2167_v41 = vpop.eup %2166  ;;  %v1429_v55 = vsel %vm846_vm6, %v2165_v36, 0.0 }
 0x5dc   : > { %v1431_v49 = vsel %vm851_vm7, %v2167_v41, 0.0 }
 0x5dd   : > { %v1428_v43 = vadd.f32 %v1427_v40, %v1426_v38 }
 0x5df   : > { %v1430_v45 = vadd.f32 %v1429_v55, %v1428_v43 }
 0x5e1   : > { %v1432_v50 = vadd.f32 %v1431_v49, %v1430_v45 }
 0x5e3   : > { %v1433_v51 = vrot.slane %v1432_v50, 4 }
 0x5e5   : > { %v1434_v52 = vadd.f32 %v1433_v51, %v1432_v50 }
 0x5e7   : > { %v1435_v53 = vrot.slane %v1434_v52, 2 }
 0x5e9   : > { %v1436_v56 = vadd.f32 %v1435_v53, %v1434_v52 }
 0x5eb   : > { %v1437_v57 = vrot.slane %v1436_v56, 1 }
 0x5ed   : > { %v1438_v34 = vadd.f32 %v1437_v57, %v1436_v56 }
 0x5ef   : > { %2168 = vrcp.f32 %v1438_v34 }
 0x5fc   : > { %v2169_v39 = vpop.eup %2168 }
 0x5fd   : > { %v1440_v59 = vmul.f32 %v2169_v39, %v2163_v33  ;;  %v1441_v60 = vmul.f32 %v2169_v39, %v2159_v29  ;;  %v1442_v61 = vmul.f32 %v2169_v39, %v2161_v30  ;;  %v1443_v63 = vmul.f32 %v2169_v39, %v2165_v36 }
 0x5fe   : > { %v1444_v32 = vmul.f32 %v2169_v39, %v2167_v41 }
 0x5ff   : > { %1445 = vxpose.xlu0.b32.start [1/5] (short) (narrow) %v1440_v59, 16 }
 0x603   : > { %1446 = vxpose.xlu0.b32.cont [2/5] (short) (narrow) %v1441_v60, 16 }
 0x607   : > { %1447 = vxpose.xlu0.b32.cont [3/5] (short) (narrow) %v1442_v61, 16 }
 0x60b   : > { %1448 = vxpose.xlu0.b32.cont [4/5] (short) (narrow) %v1443_v63, 16 }
 0x60f   : > { %1449 = vxpose.xlu0.b32.end [5/5] (short) (narrow) %v1444_v32, 16 }
 0x67b   : > { %v1461_v44 = vpop.trf.xlu0 }
 0x67c   : > { %2052 = vmatprep.mubr.msk.f32.mxu1 %vm736_vm5, %v1461_v44 }
 0x67f   : > { %v1462_v1 = vpop.trf.xlu0 }
 0x680   : > { %2053 = vmatmul.mubr.msk.f32.vlgmr.msra.gmra.mxu1 %vm736_vm5, %v1462_v1 }
 0x681   : > { %2056 = vmatpush3.msk.msra.mxu1 %vm752_vm4, %v2448_v12  ;;  %2065 = vmatprep.mubr.msk.f32.mxu1 %vm736_vm5, %v1576_v0 }
 0x682   : > { %2057 = vmatprep.subr.mxu1 %v2442_v10 }
 0x683   : > { %2058 = vmatpush3.msra.mxu1 %v2442_v10 }
 0x684   : > { %2059 = vmatprep.subr.mxu1 %v2436_v7 }
 0x685   : > { %2060 = vmatpush3.msra.mxu1 %v2436_v7 }
 0x686   : > { %2061 = vmatprep.subr.mxu1 %v2430_v5 }
 0x687   : > { %2062 = vmatpush3.msra.mxu1 %v2430_v5 }
 0x688   : > { %2063 = vmatprep.subr.mxu1 %v2424_v42 }
 0x689   : > { %2064 = vmatpush3.msra.mxu1 %v2424_v42 }
 0x68a   : > { %2066 = vmatmul.mubr.msk.f32.vlgmr.msra.gmra.mxu1 %vm736_vm5, %v1577_v2 }
 0x740   : > { %v2054_v12 = vpop.f32.mrf.mxu1 }
 0x742   : > { %v1551_v48 = vpop.f32.mrf.mxu1 }
 0x74a   : > { %v2067_v54 = vpop.f32.mrf.mxu1 }
 0x74b   : > { %v1672_v37 = vadd.f32 %v2067_v54, %v2054_v12 }
 0x74c   : > { %v1666_v10 = vpop.f32.mrf.mxu1 }
 0x74d   : > { %v1676_v28 = vmul.f32 0.1, %v1672_v37  ;;  %v1667_v47 = vadd.f32 %v1666_v10, %v1551_v48 }
 0x74f   : > { %v1678_v7 = vmul.f32 %v1676_v28, %v1676_v28  ;;  %v1675_v6 = vmul.f32 0.1, %v1667_v47 }
 0x751   : > { %v1677_v58 = vmul.f32 %v1675_v6, %v1675_v6  ;;  %v1683_v5 = vsel %vm1682_vm8, %v1678_v7, 0.0 }
 0x752   : > { %1684 = vadd.xlane.f32.xlu1 %v1683_v5 }
 0x753   : > { %v1679_v9 = vsel %vm397_vm0, %v1677_v58, 0.0 }
 0x754   : > { %1680 = vadd.xlane.f32.xlu0 %v1679_v9 }
 0x7db   : > { %v1685_v42 = vpop.xlane.xlu1 %1684 }
 0x7dc   : > { %v1687_v11 = vadd.f32 1e-12, %v1685_v42  ;;  %v1693_v46 = vadd.f32 1.0, %v1685_v42 }
 0x7dd   : > { %v1681_v62 = vpop.xlane.xlu0 %1680 }
 0x7de   : > { %2170 = vlog2.f32 %v1687_v11  ;;  %v1686_v13 = vadd.f32 1e-12, %v1681_v62  ;;  %v1692_v4 = vadd.f32 1.0, %v1681_v62 }
 0x7df   : > { %2172 = vlog2.f32 %v1693_v46 }
 0x7e0   : > { %2174 = vlog2.f32 %v1686_v13 }
 0x7e1   : > { %2176 = vlog2.f32 %v1692_v4 }
 0x7eb   : > { %v2171_v3 = vpop.eup %2170 }
 0x7ec   : > { %v2173_v15 = vpop.eup %2172  ;;  %v1691_v16 = vmul.f32 0.6931472, %v2171_v3 }
 0x7ed   : > { %v2175_v17 = vpop.eup %2174  ;;  %v1697_v8 = vmul.f32 0.6931472, %v2173_v15 }
 0x7ee   : > { %v2177_v18 = vpop.eup %2176  ;;  %v1689_v19 = vmul.f32 0.6931472, %v2175_v17 }
 0x7ef   : > { %v1699_v20 = vsub.f32 %v1691_v16, %v1697_v8  ;;  %v1695_v21 = vmul.f32 0.6931472, %v2177_v18 }
 0x7f1   : > { %1703 = vst.msk [vmem:[%s278_s28 + $0x8] sm:$0x3] %vm1702_vm9, %v1699_v20  ;;  %v1698_v14 = vsub.f32 %v1689_v19, %v1695_v21 }
 0x7f3   : > { %1701 = vst.msk [vmem:[%s278_s28] sm:$0xff] %vm1700_vm10, %v1698_v14 }
 0x7f4 PF: > { %s17_s24 = sadd.s32 1, %s2184_s24  }
 0x7f5   : > { %p14_p4 = scmp.ge.s32.totalorder %s17_s24, 4  }
 0x7f7   :  { %16 = sbr.rel (!%p14_p4) target bundleno = 1 (0x1), region = 80 }

</bundles_post_ra>
